<compile_context>
chip_gen: v5e
topology: v5e:2x2
jax: 0.10.0
libtpu: 0.0.40
codegen_flags: <defaults>
</compile_context>

<pallas_src>
import functools

import jax
import jax.numpy as jnp
from jax.experimental import pallas as pl
from jax.experimental.pallas import tpu as pltpu  # noqa: F401  (TPU backend)


# ----------------------------- kernel 1: LSTM -------------------------------

def lstm_kernel(x_ref, wih_ref, whh_ref, b_ref, h0_ref, c0_ref, out_ref, *, S, B, H):
    # x_ref: (S*B, Din) time-major rows (t*B + b). Input projection hoisted out
    # of the recurrence as one matmul; recurrence is a fully-unrolled loop with
    # h/c carried as VMEM values. Gate order i, f, g, o (PyTorch).
    xg = jnp.dot(x_ref[...], wih_ref[...],
                 preferred_element_type=jnp.float32) + b_ref[...]        # (S*B, 4H)
    h = h0_ref[...]
    c = c0_ref[...]
    hs = []
    for t in range(S):
        g = xg[t * B:(t + 1) * B, :] + jnp.dot(h, whh_ref[...],
                                               preferred_element_type=jnp.float32)
        i = jax.nn.sigmoid(g[:, 0 * H:1 * H])
        f = jax.nn.sigmoid(g[:, 1 * H:2 * H])
        gg = jnp.tanh(g[:, 2 * H:3 * H])
        o = jax.nn.sigmoid(g[:, 3 * H:4 * H])
        c = f * c + i * gg
        h = o * jnp.tanh(c)
        hs.append(h)
    # Assemble batch-major (rows b*S + t) so downstream kernels never re-layout.
    rows = [jnp.concatenate([hs[t][b:b + 1, :] for t in range(S)], axis=0)
            for b in range(B)]
    out_ref[...] = jnp.concatenate(rows, axis=0)                          # (B*S, H)


# ----------------------- kernel 2: fused transformer -------------------------

def block_kernel(h_ref, ln1g_ref, ln1b_ref, wqkv_ref, bqkv_ref, wo_ref, bo_ref,
                 ln2g_ref, ln2b_ref, w1_ref, b1_ref, w2_ref, b2_ref, o_ref, *,
                 depth, B, S, n_head, d_k, d_v, scale, eps):
    def layernorm(x, g, b):
        mu = jnp.mean(x, axis=-1, keepdims=True)
        xc = x - mu
        var = jnp.mean(xc * xc, axis=-1, keepdims=True)
        return xc * jax.lax.rsqrt(var + eps) * g + b

    h = h_ref[...]                                    # (B*S, E) batch-major
    q_off = 0
    k_off = n_head * d_k
    v_off = 2 * n_head * d_k
    inv_scale = 1.0 / scale
    for _ in range(depth):                            # same weights every iteration (as in the reference)
        # --- residual attention branch ---
        z = layernorm(h, ln1g_ref[...], ln1b_ref[...])
        qkv = jnp.dot(z, wqkv_ref[...],
                      preferred_element_type=jnp.float32) + bqkv_ref[...]   # (B*S, 3*Hh*dk)
        batch_rows = []
        for b in range(B):
            r0 = b * S
            heads = []
            for hh in range(n_head):
                qh = qkv[r0:r0 + S, q_off + hh * d_k:q_off + (hh + 1) * d_k]
                kh = qkv[r0:r0 + S, k_off + hh * d_k:k_off + (hh + 1) * d_k]
                vh = qkv[r0:r0 + S, v_off + hh * d_v:v_off + (hh + 1) * d_v]
                s = jnp.dot(qh, kh.T, preferred_element_type=jnp.float32) * inv_scale
                s = s - jnp.max(s, axis=-1, keepdims=True)     # stable softmax (dim=2)
                p = jnp.exp(s)
                p = p * pl.reciprocal(jnp.sum(p, axis=-1, keepdims=True), approx=True)
                heads.append(jnp.dot(p, vh, preferred_element_type=jnp.float32))
            batch_rows.append(jnp.concatenate(heads, axis=1))   # (S, Hh*d_v)
        attn = jnp.concatenate(batch_rows, axis=0)              # (B*S, Hh*d_v)
        h = h + jnp.dot(attn, wo_ref[...],
                        preferred_element_type=jnp.float32) + bo_ref[...]
        # --- residual feedforward branch ---
        z2 = layernorm(h, ln2g_ref[...], ln2b_ref[...])
        ff = jnp.dot(z2, w1_ref[...], preferred_element_type=jnp.float32) + b1_ref[...]
        # TODO(synk): PyTorch nn.GELU defaults to the exact erf form; tanh approx used here.
        ff = jax.nn.gelu(ff, approximate=True)
        ff = jnp.dot(ff, w2_ref[...], preferred_element_type=jnp.float32) + b2_ref[...]
        h = h + ff
    o_ref[...] = h


# ------------------- kernel 3: conv + BN + flatten + fc ----------------------

def head_kernel(h_ref, convw_ref, convb_ref, bns_ref, bnb_ref, fcw_ref, fcb_ref,
                out_ref, *, B, S, C):
    # h_ref: (B*S, E) channels-last. convw_ref: (3, E, C) taps (t-1, t, t+1).
    zr = jnp.zeros((1, C), jnp.float32)
    for b in range(B):
        x = h_ref[b * S:(b + 1) * S, :]                           # (S, E)
        y = jnp.dot(x, convw_ref[1], preferred_element_type=jnp.float32)
        y_lo = jnp.dot(x[:S - 1, :], convw_ref[0], preferred_element_type=jnp.float32)
        y_hi = jnp.dot(x[1:, :], convw_ref[2], preferred_element_type=jnp.float32)
        y = y + jnp.concatenate([zr, y_lo], axis=0) + jnp.concatenate([y_hi, zr], axis=0)
        y = y + convb_ref[...]
        y = y * bns_ref[...] + bnb_ref[...]                       # eval-mode BatchNorm1d
        # permute(0,2,1) + Flatten(1,2): flat[c*S + t] == y[t, c]; fcw_ref is the
        # final Linear weight pre-rearranged to (S, C), so the FC is mul + reduce.
        val = jnp.sum(jnp.sum(y * fcw_ref[...], axis=1, keepdims=True),
                      axis=0, keepdims=True)                      # (1, 1)
        out_ref[b:b + 1, :] = jnp.maximum(val + fcb_ref[...], 0.0)


# ------------------------- parameters & forward -----------------------------

def init_params(key, cfg):
    S = cfg["seq_len"]; Din = cfg["in_dim"]
    E = cfg["embed_dim"]; Hh = cfg["n_head"]; dk = cfg["d_k"]; dv = cfg["d_v"]
    fe = cfg["forward_expansion"]; C = cfg["cnn1"]
    keys = jax.random.split(key, 24)

    def u(k, shape, fan):
        s = 1.0 / (fan ** 0.5)
        return jax.random.uniform(k, shape, jnp.float32, -s, s)

    p = {}
    # LSTM (weights pre-transposed to (in, 4H)/(H, 4H); gate order i,f,g,o)
    # TODO(synk): PyTorch LSTM carries b_ih + b_hh; a loaded checkpoint must sum them into lstm_b.
    p["lstm_wih"] = u(keys[0], (Din, 4 * E), E)
    p["lstm_whh"] = u(keys[1], (E, 4 * E), E)
    p["lstm_b"] = u(keys[2], (1, 4 * E), E)
    # LayerNorms
    p["ln1_g"] = jnp.ones((1, E), jnp.float32); p["ln1_b"] = jnp.zeros((1, E), jnp.float32)
    p["ln2_g"] = jnp.ones((1, E), jnp.float32); p["ln2_b"] = jnp.zeros((1, E), jnp.float32)
    # multi_SelfAttention: z@wq then fc_q is a pure linear chain (no bias on the first
    # stage), so the two projections are composed into a single lane-dense matmul.
    wq = u(keys[3], (E, dk), dk); wk = u(keys[4], (E, dk), dk); wv = u(keys[5], (E, dv), dv)
    fcq_w = u(keys[6], (dk, Hh * dk), dk); fcq_b = u(keys[7], (Hh * dk,), dk)
    fck_w = u(keys[8], (dk, Hh * dk), dk); fck_b = u(keys[9], (Hh * dk,), dk)
    fcv_w = u(keys[10], (dv, Hh * dv), dv); fcv_b = u(keys[11], (Hh * dv,), dv)
    p["wqkv"] = jnp.concatenate([wq @ fcq_w, wk @ fck_w, wv @ fcv_w], axis=1)  # (E, 3*Hh*dk)
    p["bqkv"] = jnp.concatenate([fcq_b, fck_b, fcv_b]).reshape(1, -1)
    p["fco_w"] = u(keys[12], (Hh * dv, E), Hh * dv)
    p["fco_b"] = u(keys[13], (1, E), Hh * dv)
    # feedforward
    p["ff1_w"] = u(keys[14], (E, fe * E), E); p["ff1_b"] = u(keys[15], (1, fe * E), E)
    p["ff2_w"] = u(keys[16], (fe * E, E), fe * E); p["ff2_b"] = u(keys[17], (1, E), fe * E)
    # Conv1d laid out (kernel, in_ch, out_ch) for channels-last matmuls + eval BN
    p["conv_w"] = u(keys[18], (3, E, C), 3 * E)
    p["conv_b"] = u(keys[19], (1, C), 3 * E)
    eps = 1e-5
    p["bn_scale"] = jnp.ones((1, C), jnp.float32) / jnp.sqrt(1.0 + eps)   # running_var = 1
    p["bn_shift"] = jnp.zeros((1, C), jnp.float32)                        # running_mean = 0
    # Final fc: weight (C*S, 1) rearranged so index c*S+t lines up with the
    # channels-last conv output y[t, c]  ->  shape (S, C).
    fc_w = u(keys[20], (C * S, 1), C * S)
    p["fc_w_sc"] = fc_w.reshape(C, S).T
    p["fc_b"] = u(keys[21], (1, 1), C * S)
    return p


def generator_forward(params, x, h0, c0, cfg):
    B, S, _ = x.shape
    E = cfg["embed_dim"]; Hh = cfg["n_head"]; dk = cfg["d_k"]; dv = cfg["d_v"]
    C = cfg["cnn1"]

    # ---- LSTM (single pallas_call; recurrence fully in VMEM) ----
    x_tm = jnp.transpose(x, (1, 0, 2)).reshape(S * B, x.shape[-1])   # time-major rows t*B+b
    h = pl.pallas_call(
        functools.partial(lstm_kernel, S=S, B=B, H=E),
        out_shape=jax.ShapeDtypeStruct((B * S, E), jnp.float32),
    )(x_tm, params["lstm_wih"], params["lstm_whh"], params["lstm_b"], h0, c0)

    # ---- fused transformer stack (single pallas_call for all depth iterations) ----
    # TODO(synk): Dropout layers are identity (inference semantics).
    h = pl.pallas_call(
        functools.partial(block_kernel, depth=cfg["depth"], B=B, S=S, n_head=Hh,
                          d_k=dk, d_v=dv, scale=float(dk) ** 0.5, eps=1e-5),
        out_shape=jax.ShapeDtypeStruct((B * S, E), jnp.float32),
    )(h, params["ln1_g"], params["ln1_b"], params["wqkv"], params["bqkv"],
      params["fco_w"], params["fco_b"], params["ln2_g"], params["ln2_b"],
      params["ff1_w"], params["ff1_b"], params["ff2_w"], params["ff2_b"])

    # ---- fused Conv1d + BatchNorm1d + Flatten + Linear + ReLU (single pallas_call) ----
    out = pl.pallas_call(
        functools.partial(head_kernel, B=B, S=S, C=C),
        out_shape=jax.ShapeDtypeStruct((B, 1), jnp.float32),
    )(h, params["conv_w"], params["conv_b"], params["bn_scale"], params["bn_shift"],
      params["fc_w_sc"], params["fc_b"])
    return out  # (B, 1)


# --------------------------------- main -------------------------------------

if __name__ == "__main__":
    cfg = dict(in_dim=4, embed_dim=32, seq_len=8, n_head=2, d_k=16, d_v=16,
               batch_size=2, depth=1, attn_drop_rate=0.0, forward_drop_rate=0.0,
               forward_expansion=2, cnn1=8)

    key = jax.random.PRNGKey(0)
    kx, kh, kc, kp = jax.random.split(key, 4)
    x = jax.random.normal(kx, (cfg["batch_size"], cfg["seq_len"], cfg["in_dim"]),
                          jnp.float32)
    # deterministic stand-ins for the torch.randn initial LSTM states
    h0 = jax.random.normal(kh, (cfg["batch_size"], cfg["embed_dim"]), jnp.float32)
    c0 = jax.random.normal(kc, (cfg["batch_size"], cfg["embed_dim"]), jnp.float32)

    params = init_params(kp, cfg)
    fwd = jax.jit(functools.partial(generator_forward, cfg=cfg))
    out = jax.block_until_ready(fwd(params, x, h0, c0))

    assert out.shape == (cfg["batch_size"], 1), out.shape
    assert bool(jnp.all(jnp.isfinite(out)))
    print("KERNEL_OK")
</pallas_src>

<mosaic_0001>
module attributes {stable_mosaic.version = 11 : i64} {
  func.func @block_kernel(%arg0: memref<16x32xf32, #tpu.memory_space<vmem>>, %arg1: memref<1x32xf32, #tpu.memory_space<vmem>>, %arg2: memref<1x32xf32, #tpu.memory_space<vmem>>, %arg3: memref<32x96xf32, #tpu.memory_space<vmem>>, %arg4: memref<1x96xf32, #tpu.memory_space<vmem>>, %arg5: memref<32x32xf32, #tpu.memory_space<vmem>>, %arg6: memref<1x32xf32, #tpu.memory_space<vmem>>, %arg7: memref<1x32xf32, #tpu.memory_space<vmem>>, %arg8: memref<1x32xf32, #tpu.memory_space<vmem>>, %arg9: memref<32x64xf32, #tpu.memory_space<vmem>>, %arg10: memref<1x64xf32, #tpu.memory_space<vmem>>, %arg11: memref<64x32xf32, #tpu.memory_space<vmem>>, %arg12: memref<1x32xf32, #tpu.memory_space<vmem>>, %arg13: memref<16x32xf32, #tpu.memory_space<vmem>>) attributes {dimension_semantics = [], scalar_prefetch = 0 : i64, scratch_operands = 0 : i64, tpu.core_type = #tpu.core_type<tc>} {
    %c0 = arith.constant 0 : index
    %c0_0 = arith.constant 0 : index
    %0 = vector.load %arg0[%c0, %c0_0] : memref<16x32xf32, #tpu.memory_space<vmem>>, vector<16x32xf32>
    %c0_1 = arith.constant 0 : index
    %c0_2 = arith.constant 0 : index
    %1 = vector.load %arg1[%c0_1, %c0_2] : memref<1x32xf32, #tpu.memory_space<vmem>>, vector<1x32xf32>
    %c0_3 = arith.constant 0 : index
    %c0_4 = arith.constant 0 : index
    %2 = vector.load %arg2[%c0_3, %c0_4] : memref<1x32xf32, #tpu.memory_space<vmem>>, vector<1x32xf32>
    %cst = arith.constant dense<0.000000e+00> : vector<16xf32>
    %3 = vector.multi_reduction <add>, %0, %cst [1] : vector<16x32xf32> to vector<16xf32>
    %4 = vector.shape_cast %3 : vector<16xf32> to vector<16x1xf32>
    %cst_5 = arith.constant 3.200000e+01 : f32
    %5 = vector.broadcast %cst_5 : f32 to vector<16x1xf32>
    %6 = arith.divf %4, %5 : vector<16x1xf32>
    %7 = vector.broadcast %6 : vector<16x1xf32> to vector<16x32xf32>
    %8 = arith.subf %0, %7 : vector<16x32xf32>
    %9 = arith.mulf %8, %8 : vector<16x32xf32>
    %cst_6 = arith.constant dense<0.000000e+00> : vector<16xf32>
    %10 = vector.multi_reduction <add>, %9, %cst_6 [1] : vector<16x32xf32> to vector<16xf32>
    %11 = vector.shape_cast %10 : vector<16xf32> to vector<16x1xf32>
    %cst_7 = arith.constant 3.200000e+01 : f32
    %12 = vector.broadcast %cst_7 : f32 to vector<16x1xf32>
    %13 = arith.divf %11, %12 : vector<16x1xf32>
    %cst_8 = arith.constant 9.99999974E-6 : f32
    %14 = vector.broadcast %cst_8 : f32 to vector<16x1xf32>
    %15 = arith.addf %13, %14 : vector<16x1xf32>
    %16 = math.rsqrt %15 : vector<16x1xf32>
    %17 = vector.broadcast %16 : vector<16x1xf32> to vector<16x32xf32>
    %18 = arith.mulf %8, %17 : vector<16x32xf32>
    %19 = vector.broadcast %1 : vector<1x32xf32> to vector<16x32xf32>
    %20 = arith.mulf %18, %19 : vector<16x32xf32>
    %21 = vector.broadcast %2 : vector<1x32xf32> to vector<16x32xf32>
    %22 = arith.addf %20, %21 : vector<16x32xf32>
    %c0_9 = arith.constant 0 : index
    %c0_10 = arith.constant 0 : index
    %23 = vector.load %arg3[%c0_9, %c0_10] : memref<32x96xf32, #tpu.memory_space<vmem>>, vector<32x96xf32>
    %cst_11 = arith.constant dense<0.000000e+00> : vector<16x96xf32>
    %24 = tpu.matmul %22, %23, %cst_11 {dimension_numbers = #tpu.dot_dimension_numbers<[1], [0], [0], [1], [0, 0, 1, 1], [], []>} : vector<16x32xf32>, vector<32x96xf32>, vector<16x96xf32> -> vector<16x96xf32>
    %c0_12 = arith.constant 0 : index
    %c0_13 = arith.constant 0 : index
    %25 = vector.load %arg4[%c0_12, %c0_13] : memref<1x96xf32, #tpu.memory_space<vmem>>, vector<1x96xf32>
    %26 = vector.broadcast %25 : vector<1x96xf32> to vector<16x96xf32>
    %27 = arith.addf %24, %26 : vector<16x96xf32>
    %28 = vector.extract_strided_slice %27 {offsets = [0, 0], sizes = [8, 16], strides = [1, 1]} : vector<16x96xf32> to vector<8x16xf32>
    %29 = vector.extract_strided_slice %27 {offsets = [0, 32], sizes = [8, 16], strides = [1, 1]} : vector<16x96xf32> to vector<8x16xf32>
    %30 = vector.extract_strided_slice %27 {offsets = [0, 64], sizes = [8, 16], strides = [1, 1]} : vector<16x96xf32> to vector<8x16xf32>
    %31 = tpu.transpose %29, [1, 0] : vector<8x16xf32> -> vector<16x8xf32>
    %cst_14 = arith.constant dense<0.000000e+00> : vector<8x8xf32>
    %32 = tpu.matmul %28, %31, %cst_14 {dimension_numbers = #tpu.dot_dimension_numbers<[1], [0], [0], [1], [0, 0, 1, 1], [], []>} : vector<8x16xf32>, vector<16x8xf32>, vector<8x8xf32> -> vector<8x8xf32>
    %cst_15 = arith.constant 2.500000e-01 : f32
    %33 = vector.broadcast %cst_15 : f32 to vector<8x8xf32>
    %34 = arith.mulf %32, %33 : vector<8x8xf32>
    %cst_16 = arith.constant dense<0xFF800000> : vector<8xf32>
    %35 = vector.multi_reduction <maximumf>, %34, %cst_16 [1] : vector<8x8xf32> to vector<8xf32>
    %36 = vector.shape_cast %35 : vector<8xf32> to vector<8x1xf32>
    %37 = vector.broadcast %36 : vector<8x1xf32> to vector<8x8xf32>
    %38 = arith.subf %34, %37 : vector<8x8xf32>
    %39 = math.exp %38 : vector<8x8xf32>
    %cst_17 = arith.constant dense<0.000000e+00> : vector<8xf32>
    %40 = vector.multi_reduction <add>, %39, %cst_17 [1] : vector<8x8xf32> to vector<8xf32>
    %41 = vector.shape_cast %40 : vector<8xf32> to vector<8x1xf32>
    %42 = tpu.reciprocal %41 {approx = true} : vector<8x1xf32> -> vector<8x1xf32>
    %43 = vector.broadcast %42 : vector<8x1xf32> to vector<8x8xf32>
    %44 = arith.mulf %39, %43 : vector<8x8xf32>
    %cst_18 = arith.constant dense<0.000000e+00> : vector<8x16xf32>
    %45 = tpu.matmul %44, %30, %cst_18 {dimension_numbers = #tpu.dot_dimension_numbers<[1], [0], [0], [1], [0, 0, 1, 1], [], []>} : vector<8x8xf32>, vector<8x16xf32>, vector<8x16xf32> -> vector<8x16xf32>
    %46 = vector.extract_strided_slice %27 {offsets = [0, 16], sizes = [8, 16], strides = [1, 1]} : vector<16x96xf32> to vector<8x16xf32>
    %47 = vector.extract_strided_slice %27 {offsets = [0, 48], sizes = [8, 16], strides = [1, 1]} : vector<16x96xf32> to vector<8x16xf32>
    %48 = vector.extract_strided_slice %27 {offsets = [0, 80], sizes = [8, 16], strides = [1, 1]} : vector<16x96xf32> to vector<8x16xf32>
    %49 = tpu.transpose %47, [1, 0] : vector<8x16xf32> -> vector<16x8xf32>
    %cst_19 = arith.constant dense<0.000000e+00> : vector<8x8xf32>
    %50 = tpu.matmul %46, %49, %cst_19 {dimension_numbers = #tpu.dot_dimension_numbers<[1], [0], [0], [1], [0, 0, 1, 1], [], []>} : vector<8x16xf32>, vector<16x8xf32>, vector<8x8xf32> -> vector<8x8xf32>
    %cst_20 = arith.constant 2.500000e-01 : f32
    %51 = vector.broadcast %cst_20 : f32 to vector<8x8xf32>
    %52 = arith.mulf %50, %51 : vector<8x8xf32>
    %cst_21 = arith.constant dense<0xFF800000> : vector<8xf32>
    %53 = vector.multi_reduction <maximumf>, %52, %cst_21 [1] : vector<8x8xf32> to vector<8xf32>
    %54 = vector.shape_cast %53 : vector<8xf32> to vector<8x1xf32>
    %55 = vector.broadcast %54 : vector<8x1xf32> to vector<8x8xf32>
    %56 = arith.subf %52, %55 : vector<8x8xf32>
    %57 = math.exp %56 : vector<8x8xf32>
    %cst_22 = arith.constant dense<0.000000e+00> : vector<8xf32>
    %58 = vector.multi_reduction <add>, %57, %cst_22 [1] : vector<8x8xf32> to vector<8xf32>
    %59 = vector.shape_cast %58 : vector<8xf32> to vector<8x1xf32>
    %60 = tpu.reciprocal %59 {approx = true} : vector<8x1xf32> -> vector<8x1xf32>
    %61 = vector.broadcast %60 : vector<8x1xf32> to vector<8x8xf32>
    %62 = arith.mulf %57, %61 : vector<8x8xf32>
    %cst_23 = arith.constant dense<0.000000e+00> : vector<8x16xf32>
    %63 = tpu.matmul %62, %48, %cst_23 {dimension_numbers = #tpu.dot_dimension_numbers<[1], [0], [0], [1], [0, 0, 1, 1], [], []>} : vector<8x8xf32>, vector<8x16xf32>, vector<8x16xf32> -> vector<8x16xf32>
    %64 = tpu.concatenate %45, %63 in 1 : vector<8x16xf32>, vector<8x16xf32> -> vector<8x32xf32>
    %65 = vector.extract_strided_slice %27 {offsets = [8, 0], sizes = [8, 16], strides = [1, 1]} : vector<16x96xf32> to vector<8x16xf32>
    %66 = vector.extract_strided_slice %27 {offsets = [8, 32], sizes = [8, 16], strides = [1, 1]} : vector<16x96xf32> to vector<8x16xf32>
    %67 = vector.extract_strided_slice %27 {offsets = [8, 64], sizes = [8, 16], strides = [1, 1]} : vector<16x96xf32> to vector<8x16xf32>
    %68 = tpu.transpose %66, [1, 0] : vector<8x16xf32> -> vector<16x8xf32>
    %cst_24 = arith.constant dense<0.000000e+00> : vector<8x8xf32>
    %69 = tpu.matmul %65, %68, %cst_24 {dimension_numbers = #tpu.dot_dimension_numbers<[1], [0], [0], [1], [0, 0, 1, 1], [], []>} : vector<8x16xf32>, vector<16x8xf32>, vector<8x8xf32> -> vector<8x8xf32>
    %cst_25 = arith.constant 2.500000e-01 : f32
    %70 = vector.broadcast %cst_25 : f32 to vector<8x8xf32>
    %71 = arith.mulf %69, %70 : vector<8x8xf32>
    %cst_26 = arith.constant dense<0xFF800000> : vector<8xf32>
    %72 = vector.multi_reduction <maximumf>, %71, %cst_26 [1] : vector<8x8xf32> to vector<8xf32>
    %73 = vector.shape_cast %72 : vector<8xf32> to vector<8x1xf32>
    %74 = vector.broadcast %73 : vector<8x1xf32> to vector<8x8xf32>
    %75 = arith.subf %71, %74 : vector<8x8xf32>
    %76 = math.exp %75 : vector<8x8xf32>
    %cst_27 = arith.constant dense<0.000000e+00> : vector<8xf32>
    %77 = vector.multi_reduction <add>, %76, %cst_27 [1] : vector<8x8xf32> to vector<8xf32>
    %78 = vector.shape_cast %77 : vector<8xf32> to vector<8x1xf32>
    %79 = tpu.reciprocal %78 {approx = true} : vector<8x1xf32> -> vector<8x1xf32>
    %80 = vector.broadcast %79 : vector<8x1xf32> to vector<8x8xf32>
    %81 = arith.mulf %76, %80 : vector<8x8xf32>
    %cst_28 = arith.constant dense<0.000000e+00> : vector<8x16xf32>
    %82 = tpu.matmul %81, %67, %cst_28 {dimension_numbers = #tpu.dot_dimension_numbers<[1], [0], [0], [1], [0, 0, 1, 1], [], []>} : vector<8x8xf32>, vector<8x16xf32>, vector<8x16xf32> -> vector<8x16xf32>
    %83 = vector.extract_strided_slice %27 {offsets = [8, 16], sizes = [8, 16], strides = [1, 1]} : vector<16x96xf32> to vector<8x16xf32>
    %84 = vector.extract_strided_slice %27 {offsets = [8, 48], sizes = [8, 16], strides = [1, 1]} : vector<16x96xf32> to vector<8x16xf32>
    %85 = vector.extract_strided_slice %27 {offsets = [8, 80], sizes = [8, 16], strides = [1, 1]} : vector<16x96xf32> to vector<8x16xf32>
    %86 = tpu.transpose %84, [1, 0] : vector<8x16xf32> -> vector<16x8xf32>
    %cst_29 = arith.constant dense<0.000000e+00> : vector<8x8xf32>
    %87 = tpu.matmul %83, %86, %cst_29 {dimension_numbers = #tpu.dot_dimension_numbers<[1], [0], [0], [1], [0, 0, 1, 1], [], []>} : vector<8x16xf32>, vector<16x8xf32>, vector<8x8xf32> -> vector<8x8xf32>
    %cst_30 = arith.constant 2.500000e-01 : f32
    %88 = vector.broadcast %cst_30 : f32 to vector<8x8xf32>
    %89 = arith.mulf %87, %88 : vector<8x8xf32>
    %cst_31 = arith.constant dense<0xFF800000> : vector<8xf32>
    %90 = vector.multi_reduction <maximumf>, %89, %cst_31 [1] : vector<8x8xf32> to vector<8xf32>
    %91 = vector.shape_cast %90 : vector<8xf32> to vector<8x1xf32>
    %92 = vector.broadcast %91 : vector<8x1xf32> to vector<8x8xf32>
    %93 = arith.subf %89, %92 : vector<8x8xf32>
    %94 = math.exp %93 : vector<8x8xf32>
    %cst_32 = arith.constant dense<0.000000e+00> : vector<8xf32>
    %95 = vector.multi_reduction <add>, %94, %cst_32 [1] : vector<8x8xf32> to vector<8xf32>
    %96 = vector.shape_cast %95 : vector<8xf32> to vector<8x1xf32>
    %97 = tpu.reciprocal %96 {approx = true} : vector<8x1xf32> -> vector<8x1xf32>
    %98 = vector.broadcast %97 : vector<8x1xf32> to vector<8x8xf32>
    %99 = arith.mulf %94, %98 : vector<8x8xf32>
    %cst_33 = arith.constant dense<0.000000e+00> : vector<8x16xf32>
    %100 = tpu.matmul %99, %85, %cst_33 {dimension_numbers = #tpu.dot_dimension_numbers<[1], [0], [0], [1], [0, 0, 1, 1], [], []>} : vector<8x8xf32>, vector<8x16xf32>, vector<8x16xf32> -> vector<8x16xf32>
    %101 = tpu.concatenate %82, %100 in 1 : vector<8x16xf32>, vector<8x16xf32> -> vector<8x32xf32>
    %102 = tpu.concatenate %64, %101 in 0 : vector<8x32xf32>, vector<8x32xf32> -> vector<16x32xf32>
    %c0_34 = arith.constant 0 : index
    %c0_35 = arith.constant 0 : index
    %103 = vector.load %arg5[%c0_34, %c0_35] : memref<32x32xf32, #tpu.memory_space<vmem>>, vector<32x32xf32>
    %cst_36 = arith.constant dense<0.000000e+00> : vector<16x32xf32>
    %104 = tpu.matmul %102, %103, %cst_36 {dimension_numbers = #tpu.dot_dimension_numbers<[1], [0], [0], [1], [0, 0, 1, 1], [], []>} : vector<16x32xf32>, vector<32x32xf32>, vector<16x32xf32> -> vector<16x32xf32>
    %105 = arith.addf %0, %104 : vector<16x32xf32>
    %c0_37 = arith.constant 0 : index
    %c0_38 = arith.constant 0 : index
    %106 = vector.load %arg6[%c0_37, %c0_38] : memref<1x32xf32, #tpu.memory_space<vmem>>, vector<1x32xf32>
    %107 = vector.broadcast %106 : vector<1x32xf32> to vector<16x32xf32>
    %108 = arith.addf %105, %107 : vector<16x32xf32>
    %c0_39 = arith.constant 0 : index
    %c0_40 = arith.constant 0 : index
    %109 = vector.load %arg7[%c0_39, %c0_40] : memref<1x32xf32, #tpu.memory_space<vmem>>, vector<1x32xf32>
    %c0_41 = arith.constant 0 : index
    %c0_42 = arith.constant 0 : index
    %110 = vector.load %arg8[%c0_41, %c0_42] : memref<1x32xf32, #tpu.memory_space<vmem>>, vector<1x32xf32>
    %cst_43 = arith.constant dense<0.000000e+00> : vector<16xf32>
    %111 = vector.multi_reduction <add>, %108, %cst_43 [1] : vector<16x32xf32> to vector<16xf32>
    %112 = vector.shape_cast %111 : vector<16xf32> to vector<16x1xf32>
    %cst_44 = arith.constant 3.200000e+01 : f32
    %113 = vector.broadcast %cst_44 : f32 to vector<16x1xf32>
    %114 = arith.divf %112, %113 : vector<16x1xf32>
    %115 = vector.broadcast %114 : vector<16x1xf32> to vector<16x32xf32>
    %116 = arith.subf %108, %115 : vector<16x32xf32>
    %117 = arith.mulf %116, %116 : vector<16x32xf32>
    %cst_45 = arith.constant dense<0.000000e+00> : vector<16xf32>
    %118 = vector.multi_reduction <add>, %117, %cst_45 [1] : vector<16x32xf32> to vector<16xf32>
    %119 = vector.shape_cast %118 : vector<16xf32> to vector<16x1xf32>
    %cst_46 = arith.constant 3.200000e+01 : f32
    %120 = vector.broadcast %cst_46 : f32 to vector<16x1xf32>
    %121 = arith.divf %119, %120 : vector<16x1xf32>
    %cst_47 = arith.constant 9.99999974E-6 : f32
    %122 = vector.broadcast %cst_47 : f32 to vector<16x1xf32>
    %123 = arith.addf %121, %122 : vector<16x1xf32>
    %124 = math.rsqrt %123 : vector<16x1xf32>
    %125 = vector.broadcast %124 : vector<16x1xf32> to vector<16x32xf32>
    %126 = arith.mulf %116, %125 : vector<16x32xf32>
    %127 = vector.broadcast %109 : vector<1x32xf32> to vector<16x32xf32>
    %128 = arith.mulf %126, %127 : vector<16x32xf32>
    %129 = vector.broadcast %110 : vector<1x32xf32> to vector<16x32xf32>
    %130 = arith.addf %128, %129 : vector<16x32xf32>
    %c0_48 = arith.constant 0 : index
    %c0_49 = arith.constant 0 : index
    %131 = vector.load %arg9[%c0_48, %c0_49] : memref<32x64xf32, #tpu.memory_space<vmem>>, vector<32x64xf32>
    %cst_50 = arith.constant dense<0.000000e+00> : vector<16x64xf32>
    %132 = tpu.matmul %130, %131, %cst_50 {dimension_numbers = #tpu.dot_dimension_numbers<[1], [0], [0], [1], [0, 0, 1, 1], [], []>} : vector<16x32xf32>, vector<32x64xf32>, vector<16x64xf32> -> vector<16x64xf32>
    %c0_51 = arith.constant 0 : index
    %c0_52 = arith.constant 0 : index
    %133 = vector.load %arg10[%c0_51, %c0_52] : memref<1x64xf32, #tpu.memory_space<vmem>>, vector<1x64xf32>
    %134 = vector.broadcast %133 : vector<1x64xf32> to vector<16x64xf32>
    %135 = arith.addf %132, %134 : vector<16x64xf32>
    %136 = arith.mulf %135, %135 : vector<16x64xf32>
    %137 = arith.mulf %135, %136 : vector<16x64xf32>
    %cst_53 = arith.constant 4.471500e-02 : f32
    %138 = vector.broadcast %cst_53 : f32 to vector<16x64xf32>
    %139 = arith.mulf %138, %137 : vector<16x64xf32>
    %140 = arith.addf %135, %139 : vector<16x64xf32>
    %cst_54 = arith.constant 0.797884583 : f32
    %141 = vector.broadcast %cst_54 : f32 to vector<16x64xf32>
    %142 = arith.mulf %141, %140 : vector<16x64xf32>
    %143 = math.tanh %142 : vector<16x64xf32>
    %cst_55 = arith.constant 1.000000e+00 : f32
    %144 = vector.broadcast %cst_55 : f32 to vector<16x64xf32>
    %145 = arith.addf %144, %143 : vector<16x64xf32>
    %cst_56 = arith.constant 5.000000e-01 : f32
    %146 = vector.broadcast %cst_56 : f32 to vector<16x64xf32>
    %147 = arith.mulf %146, %145 : vector<16x64xf32>
    %148 = arith.mulf %135, %147 : vector<16x64xf32>
    %c0_57 = arith.constant 0 : index
    %c0_58 = arith.constant 0 : index
    %149 = vector.load %arg11[%c0_57, %c0_58] : memref<64x32xf32, #tpu.memory_space<vmem>>, vector<64x32xf32>
    %cst_59 = arith.constant dense<0.000000e+00> : vector<16x32xf32>
    %150 = tpu.matmul %148, %149, %cst_59 {dimension_numbers = #tpu.dot_dimension_numbers<[1], [0], [0], [1], [0, 0, 1, 1], [], []>} : vector<16x64xf32>, vector<64x32xf32>, vector<16x32xf32> -> vector<16x32xf32>
    %c0_60 = arith.constant 0 : index
    %c0_61 = arith.constant 0 : index
    %151 = vector.load %arg12[%c0_60, %c0_61] : memref<1x32xf32, #tpu.memory_space<vmem>>, vector<1x32xf32>
    %152 = vector.broadcast %151 : vector<1x32xf32> to vector<16x32xf32>
    %153 = arith.addf %150, %152 : vector<16x32xf32>
    %154 = arith.addf %108, %153 : vector<16x32xf32>
    %c0_62 = arith.constant 0 : index
    %c0_63 = arith.constant 0 : index
    %155 = vector.load %arg13[%c0_62, %c0_63] : memref<16x32xf32, #tpu.memory_space<vmem>>, vector<16x32xf32>
    tpu.vector_store %arg13[%c0_62, %c0_63], %154 {strides = array<i32>} : memref<16x32xf32, #tpu.memory_space<vmem>>, vector<16x32xf32>,
    return
  }
}

module attributes {stable_mosaic.version = 11 : i64} {
  func.func @lstm_kernel(%arg0: memref<16x4xf32, #tpu.memory_space<vmem>>, %arg1: memref<4x128xf32, #tpu.memory_space<vmem>>, %arg2: memref<32x128xf32, #tpu.memory_space<vmem>>, %arg3: memref<1x128xf32, #tpu.memory_space<vmem>>, %arg4: memref<2x32xf32, #tpu.memory_space<vmem>>, %arg5: memref<2x32xf32, #tpu.memory_space<vmem>>, %arg6: memref<16x32xf32, #tpu.memory_space<vmem>>) attributes {dimension_semantics = [], scalar_prefetch = 0 : i64, scratch_operands = 0 : i64, tpu.core_type = #tpu.core_type<tc>} {
    %c0 = arith.constant 0 : index
    %c0_0 = arith.constant 0 : index
    %0 = vector.load %arg0[%c0, %c0_0] : memref<16x4xf32, #tpu.memory_space<vmem>>, vector<16x4xf32>
    %c0_1 = arith.constant 0 : index
    %c0_2 = arith.constant 0 : index
    %1 = vector.load %arg1[%c0_1, %c0_2] : memref<4x128xf32, #tpu.memory_space<vmem>>, vector<4x128xf32>
    %cst = arith.constant dense<0.000000e+00> : vector<16x128xf32>
    %2 = tpu.matmul %0, %1, %cst {dimension_numbers = #tpu.dot_dimension_numbers<[1], [0], [0], [1], [0, 0, 1, 1], [], []>} : vector<16x4xf32>, vector<4x128xf32>, vector<16x128xf32> -> vector<16x128xf32>
    %c0_3 = arith.constant 0 : index
    %c0_4 = arith.constant 0 : index
    %3 = vector.load %arg3[%c0_3, %c0_4] : memref<1x128xf32, #tpu.memory_space<vmem>>, vector<1x128xf32>
    %4 = vector.broadcast %3 : vector<1x128xf32> to vector<16x128xf32>
    %5 = arith.addf %2, %4 : vector<16x128xf32>
    %c0_5 = arith.constant 0 : index
    %c0_6 = arith.constant 0 : index
    %6 = vector.load %arg4[%c0_5, %c0_6] : memref<2x32xf32, #tpu.memory_space<vmem>>, vector<2x32xf32>
    %c0_7 = arith.constant 0 : index
    %c0_8 = arith.constant 0 : index
    %7 = vector.load %arg5[%c0_7, %c0_8] : memref<2x32xf32, #tpu.memory_space<vmem>>, vector<2x32xf32>
    %8 = vector.extract_strided_slice %5 {offsets = [0, 0], sizes = [2, 128], strides = [1, 1]} : vector<16x128xf32> to vector<2x128xf32>
    %c0_9 = arith.constant 0 : index
    %c0_10 = arith.constant 0 : index
    %9 = vector.load %arg2[%c0_9, %c0_10] : memref<32x128xf32, #tpu.memory_space<vmem>>, vector<32x128xf32>
    %cst_11 = arith.constant dense<0.000000e+00> : vector<2x128xf32>
    %10 = tpu.matmul %6, %9, %cst_11 {dimension_numbers = #tpu.dot_dimension_numbers<[1], [0], [0], [1], [0, 0, 1, 1], [], []>} : vector<2x32xf32>, vector<32x128xf32>, vector<2x128xf32> -> vector<2x128xf32>
    %11 = arith.addf %8, %10 : vector<2x128xf32>
    %12 = vector.extract_strided_slice %11 {offsets = [0, 0], sizes = [2, 32], strides = [1, 1]} : vector<2x128xf32> to vector<2x32xf32>
    %13 = arith.negf %12 : vector<2x32xf32>
    %14 = math.exp %13 : vector<2x32xf32>
    %cst_12 = arith.constant 1.000000e+00 : f32
    %15 = vector.broadcast %cst_12 : f32 to vector<2x32xf32>
    %16 = arith.addf %15, %14 : vector<2x32xf32>
    %17 = arith.divf %15, %16 : vector<2x32xf32>
    %18 = vector.extract_strided_slice %11 {offsets = [0, 32], sizes = [2, 32], strides = [1, 1]} : vector<2x128xf32> to vector<2x32xf32>
    %19 = arith.negf %18 : vector<2x32xf32>
    %20 = math.exp %19 : vector<2x32xf32>
    %cst_13 = arith.constant 1.000000e+00 : f32
    %21 = vector.broadcast %cst_13 : f32 to vector<2x32xf32>
    %22 = arith.addf %21, %20 : vector<2x32xf32>
    %23 = arith.divf %21, %22 : vector<2x32xf32>
    %24 = vector.extract_strided_slice %11 {offsets = [0, 64], sizes = [2, 32], strides = [1, 1]} : vector<2x128xf32> to vector<2x32xf32>
    %25 = math.tanh %24 : vector<2x32xf32>
    %26 = vector.extract_strided_slice %11 {offsets = [0, 96], sizes = [2, 32], strides = [1, 1]} : vector<2x128xf32> to vector<2x32xf32>
    %27 = arith.negf %26 : vector<2x32xf32>
    %28 = math.exp %27 : vector<2x32xf32>
    %cst_14 = arith.constant 1.000000e+00 : f32
    %29 = vector.broadcast %cst_14 : f32 to vector<2x32xf32>
    %30 = arith.addf %29, %28 : vector<2x32xf32>
    %31 = arith.divf %29, %30 : vector<2x32xf32>
    %32 = arith.mulf %23, %7 : vector<2x32xf32>
    %33 = arith.mulf %17, %25 : vector<2x32xf32>
    %34 = arith.addf %32, %33 : vector<2x32xf32>
    %35 = math.tanh %34 : vector<2x32xf32>
    %36 = arith.mulf %31, %35 : vector<2x32xf32>
    %37 = vector.extract_strided_slice %5 {offsets = [2, 0], sizes = [2, 128], strides = [1, 1]} : vector<16x128xf32> to vector<2x128xf32>
    %c0_15 = arith.constant 0 : index
    %c0_16 = arith.constant 0 : index
    %38 = vector.load %arg2[%c0_15, %c0_16] : memref<32x128xf32, #tpu.memory_space<vmem>>, vector<32x128xf32>
    %cst_17 = arith.constant dense<0.000000e+00> : vector<2x128xf32>
    %39 = tpu.matmul %36, %38, %cst_17 {dimension_numbers = #tpu.dot_dimension_numbers<[1], [0], [0], [1], [0, 0, 1, 1], [], []>} : vector<2x32xf32>, vector<32x128xf32>, vector<2x128xf32> -> vector<2x128xf32>
    %40 = arith.addf %37, %39 : vector<2x128xf32>
    %41 = vector.extract_strided_slice %40 {offsets = [0, 0], sizes = [2, 32], strides = [1, 1]} : vector<2x128xf32> to vector<2x32xf32>
    %42 = arith.negf %41 : vector<2x32xf32>
    %43 = math.exp %42 : vector<2x32xf32>
    %cst_18 = arith.constant 1.000000e+00 : f32
    %44 = vector.broadcast %cst_18 : f32 to vector<2x32xf32>
    %45 = arith.addf %44, %43 : vector<2x32xf32>
    %46 = arith.divf %44, %45 : vector<2x32xf32>
    %47 = vector.extract_strided_slice %40 {offsets = [0, 32], sizes = [2, 32], strides = [1, 1]} : vector<2x128xf32> to vector<2x32xf32>
    %48 = arith.negf %47 : vector<2x32xf32>
    %49 = math.exp %48 : vector<2x32xf32>
    %cst_19 = arith.constant 1.000000e+00 : f32
    %50 = vector.broadcast %cst_19 : f32 to vector<2x32xf32>
    %51 = arith.addf %50, %49 : vector<2x32xf32>
    %52 = arith.divf %50, %51 : vector<2x32xf32>
    %53 = vector.extract_strided_slice %40 {offsets = [0, 64], sizes = [2, 32], strides = [1, 1]} : vector<2x128xf32> to vector<2x32xf32>
    %54 = math.tanh %53 : vector<2x32xf32>
    %55 = vector.extract_strided_slice %40 {offsets = [0, 96], sizes = [2, 32], strides = [1, 1]} : vector<2x128xf32> to vector<2x32xf32>
    %56 = arith.negf %55 : vector<2x32xf32>
    %57 = math.exp %56 : vector<2x32xf32>
    %cst_20 = arith.constant 1.000000e+00 : f32
    %58 = vector.broadcast %cst_20 : f32 to vector<2x32xf32>
    %59 = arith.addf %58, %57 : vector<2x32xf32>
    %60 = arith.divf %58, %59 : vector<2x32xf32>
    %61 = arith.mulf %52, %34 : vector<2x32xf32>
    %62 = arith.mulf %46, %54 : vector<2x32xf32>
    %63 = arith.addf %61, %62 : vector<2x32xf32>
    %64 = math.tanh %63 : vector<2x32xf32>
    %65 = arith.mulf %60, %64 : vector<2x32xf32>
    %66 = vector.extract_strided_slice %5 {offsets = [4, 0], sizes = [2, 128], strides = [1, 1]} : vector<16x128xf32> to vector<2x128xf32>
    %c0_21 = arith.constant 0 : index
    %c0_22 = arith.constant 0 : index
    %67 = vector.load %arg2[%c0_21, %c0_22] : memref<32x128xf32, #tpu.memory_space<vmem>>, vector<32x128xf32>
    %cst_23 = arith.constant dense<0.000000e+00> : vector<2x128xf32>
    %68 = tpu.matmul %65, %67, %cst_23 {dimension_numbers = #tpu.dot_dimension_numbers<[1], [0], [0], [1], [0, 0, 1, 1], [], []>} : vector<2x32xf32>, vector<32x128xf32>, vector<2x128xf32> -> vector<2x128xf32>
    %69 = arith.addf %66, %68 : vector<2x128xf32>
    %70 = vector.extract_strided_slice %69 {offsets = [0, 0], sizes = [2, 32], strides = [1, 1]} : vector<2x128xf32> to vector<2x32xf32>
    %71 = arith.negf %70 : vector<2x32xf32>
    %72 = math.exp %71 : vector<2x32xf32>
    %cst_24 = arith.constant 1.000000e+00 : f32
    %73 = vector.broadcast %cst_24 : f32 to vector<2x32xf32>
    %74 = arith.addf %73, %72 : vector<2x32xf32>
    %75 = arith.divf %73, %74 : vector<2x32xf32>
    %76 = vector.extract_strided_slice %69 {offsets = [0, 32], sizes = [2, 32], strides = [1, 1]} : vector<2x128xf32> to vector<2x32xf32>
    %77 = arith.negf %76 : vector<2x32xf32>
    %78 = math.exp %77 : vector<2x32xf32>
    %cst_25 = arith.constant 1.000000e+00 : f32
    %79 = vector.broadcast %cst_25 : f32 to vector<2x32xf32>
    %80 = arith.addf %79, %78 : vector<2x32xf32>
    %81 = arith.divf %79, %80 : vector<2x32xf32>
    %82 = vector.extract_strided_slice %69 {offsets = [0, 64], sizes = [2, 32], strides = [1, 1]} : vector<2x128xf32> to vector<2x32xf32>
    %83 = math.tanh %82 : vector<2x32xf32>
    %84 = vector.extract_strided_slice %69 {offsets = [0, 96], sizes = [2, 32], strides = [1, 1]} : vector<2x128xf32> to vector<2x32xf32>
    %85 = arith.negf %84 : vector<2x32xf32>
    %86 = math.exp %85 : vector<2x32xf32>
    %cst_26 = arith.constant 1.000000e+00 : f32
    %87 = vector.broadcast %cst_26 : f32 to vector<2x32xf32>
    %88 = arith.addf %87, %86 : vector<2x32xf32>
    %89 = arith.divf %87, %88 : vector<2x32xf32>
    %90 = arith.mulf %81, %63 : vector<2x32xf32>
    %91 = arith.mulf %75, %83 : vector<2x32xf32>
    %92 = arith.addf %90, %91 : vector<2x32xf32>
    %93 = math.tanh %92 : vector<2x32xf32>
    %94 = arith.mulf %89, %93 : vector<2x32xf32>
    %95 = vector.extract_strided_slice %5 {offsets = [6, 0], sizes = [2, 128], strides = [1, 1]} : vector<16x128xf32> to vector<2x128xf32>
    %c0_27 = arith.constant 0 : index
    %c0_28 = arith.constant 0 : index
    %96 = vector.load %arg2[%c0_27, %c0_28] : memref<32x128xf32, #tpu.memory_space<vmem>>, vector<32x128xf32>
    %cst_29 = arith.constant dense<0.000000e+00> : vector<2x128xf32>
    %97 = tpu.matmul %94, %96, %cst_29 {dimension_numbers = #tpu.dot_dimension_numbers<[1], [0], [0], [1], [0, 0, 1, 1], [], []>} : vector<2x32xf32>, vector<32x128xf32>, vector<2x128xf32> -> vector<2x128xf32>
    %98 = arith.addf %95, %97 : vector<2x128xf32>
    %99 = vector.extract_strided_slice %98 {offsets = [0, 0], sizes = [2, 32], strides = [1, 1]} : vector<2x128xf32> to vector<2x32xf32>
    %100 = arith.negf %99 : vector<2x32xf32>
    %101 = math.exp %100 : vector<2x32xf32>
    %cst_30 = arith.constant 1.000000e+00 : f32
    %102 = vector.broadcast %cst_30 : f32 to vector<2x32xf32>
    %103 = arith.addf %102, %101 : vector<2x32xf32>
    %104 = arith.divf %102, %103 : vector<2x32xf32>
    %105 = vector.extract_strided_slice %98 {offsets = [0, 32], sizes = [2, 32], strides = [1, 1]} : vector<2x128xf32> to vector<2x32xf32>
    %106 = arith.negf %105 : vector<2x32xf32>
    %107 = math.exp %106 : vector<2x32xf32>
    %cst_31 = arith.constant 1.000000e+00 : f32
    %108 = vector.broadcast %cst_31 : f32 to vector<2x32xf32>
    %109 = arith.addf %108, %107 : vector<2x32xf32>
    %110 = arith.divf %108, %109 : vector<2x32xf32>
    %111 = vector.extract_strided_slice %98 {offsets = [0, 64], sizes = [2, 32], strides = [1, 1]} : vector<2x128xf32> to vector<2x32xf32>
    %112 = math.tanh %111 : vector<2x32xf32>
    %113 = vector.extract_strided_slice %98 {offsets = [0, 96], sizes = [2, 32], strides = [1, 1]} : vector<2x128xf32> to vector<2x32xf32>
    %114 = arith.negf %113 : vector<2x32xf32>
    %115 = math.exp %114 : vector<2x32xf32>
    %cst_32 = arith.constant 1.000000e+00 : f32
    %116 = vector.broadcast %cst_32 : f32 to vector<2x32xf32>
    %117 = arith.addf %116, %115 : vector<2x32xf32>
    %118 = arith.divf %116, %117 : vector<2x32xf32>
    %119 = arith.mulf %110, %92 : vector<2x32xf32>
    %120 = arith.mulf %104, %112 : vector<2x32xf32>
    %121 = arith.addf %119, %120 : vector<2x32xf32>
    %122 = math.tanh %121 : vector<2x32xf32>
    %123 = arith.mulf %118, %122 : vector<2x32xf32>
    %124 = vector.extract_strided_slice %5 {offsets = [8, 0], sizes = [2, 128], strides = [1, 1]} : vector<16x128xf32> to vector<2x128xf32>
    %c0_33 = arith.constant 0 : index
    %c0_34 = arith.constant 0 : index
    %125 = vector.load %arg2[%c0_33, %c0_34] : memref<32x128xf32, #tpu.memory_space<vmem>>, vector<32x128xf32>
    %cst_35 = arith.constant dense<0.000000e+00> : vector<2x128xf32>
    %126 = tpu.matmul %123, %125, %cst_35 {dimension_numbers = #tpu.dot_dimension_numbers<[1], [0], [0], [1], [0, 0, 1, 1], [], []>} : vector<2x32xf32>, vector<32x128xf32>, vector<2x128xf32> -> vector<2x128xf32>
    %127 = arith.addf %124, %126 : vector<2x128xf32>
    %128 = vector.extract_strided_slice %127 {offsets = [0, 0], sizes = [2, 32], strides = [1, 1]} : vector<2x128xf32> to vector<2x32xf32>
    %129 = arith.negf %128 : vector<2x32xf32>
    %130 = math.exp %129 : vector<2x32xf32>
    %cst_36 = arith.constant 1.000000e+00 : f32
    %131 = vector.broadcast %cst_36 : f32 to vector<2x32xf32>
    %132 = arith.addf %131, %130 : vector<2x32xf32>
    %133 = arith.divf %131, %132 : vector<2x32xf32>
    %134 = vector.extract_strided_slice %127 {offsets = [0, 32], sizes = [2, 32], strides = [1, 1]} : vector<2x128xf32> to vector<2x32xf32>
    %135 = arith.negf %134 : vector<2x32xf32>
    %136 = math.exp %135 : vector<2x32xf32>
    %cst_37 = arith.constant 1.000000e+00 : f32
    %137 = vector.broadcast %cst_37 : f32 to vector<2x32xf32>
    %138 = arith.addf %137, %136 : vector<2x32xf32>
    %139 = arith.divf %137, %138 : vector<2x32xf32>
    %140 = vector.extract_strided_slice %127 {offsets = [0, 64], sizes = [2, 32], strides = [1, 1]} : vector<2x128xf32> to vector<2x32xf32>
    %141 = math.tanh %140 : vector<2x32xf32>
    %142 = vector.extract_strided_slice %127 {offsets = [0, 96], sizes = [2, 32], strides = [1, 1]} : vector<2x128xf32> to vector<2x32xf32>
    %143 = arith.negf %142 : vector<2x32xf32>
    %144 = math.exp %143 : vector<2x32xf32>
    %cst_38 = arith.constant 1.000000e+00 : f32
    %145 = vector.broadcast %cst_38 : f32 to vector<2x32xf32>
    %146 = arith.addf %145, %144 : vector<2x32xf32>
    %147 = arith.divf %145, %146 : vector<2x32xf32>
    %148 = arith.mulf %139, %121 : vector<2x32xf32>
    %149 = arith.mulf %133, %141 : vector<2x32xf32>
    %150 = arith.addf %148, %149 : vector<2x32xf32>
    %151 = math.tanh %150 : vector<2x32xf32>
    %152 = arith.mulf %147, %151 : vector<2x32xf32>
    %153 = vector.extract_strided_slice %5 {offsets = [10, 0], sizes = [2, 128], strides = [1, 1]} : vector<16x128xf32> to vector<2x128xf32>
    %c0_39 = arith.constant 0 : index
    %c0_40 = arith.constant 0 : index
    %154 = vector.load %arg2[%c0_39, %c0_40] : memref<32x128xf32, #tpu.memory_space<vmem>>, vector<32x128xf32>
    %cst_41 = arith.constant dense<0.000000e+00> : vector<2x128xf32>
    %155 = tpu.matmul %152, %154, %cst_41 {dimension_numbers = #tpu.dot_dimension_numbers<[1], [0], [0], [1], [0, 0, 1, 1], [], []>} : vector<2x32xf32>, vector<32x128xf32>, vector<2x128xf32> -> vector<2x128xf32>
    %156 = arith.addf %153, %155 : vector<2x128xf32>
    %157 = vector.extract_strided_slice %156 {offsets = [0, 0], sizes = [2, 32], strides = [1, 1]} : vector<2x128xf32> to vector<2x32xf32>
    %158 = arith.negf %157 : vector<2x32xf32>
    %159 = math.exp %158 : vector<2x32xf32>
    %cst_42 = arith.constant 1.000000e+00 : f32
    %160 = vector.broadcast %cst_42 : f32 to vector<2x32xf32>
    %161 = arith.addf %160, %159 : vector<2x32xf32>
    %162 = arith.divf %160, %161 : vector<2x32xf32>
    %163 = vector.extract_strided_slice %156 {offsets = [0, 32], sizes = [2, 32], strides = [1, 1]} : vector<2x128xf32> to vector<2x32xf32>
    %164 = arith.negf %163 : vector<2x32xf32>
    %165 = math.exp %164 : vector<2x32xf32>
    %cst_43 = arith.constant 1.000000e+00 : f32
    %166 = vector.broadcast %cst_43 : f32 to vector<2x32xf32>
    %167 = arith.addf %166, %165 : vector<2x32xf32>
    %168 = arith.divf %166, %167 : vector<2x32xf32>
    %169 = vector.extract_strided_slice %156 {offsets = [0, 64], sizes = [2, 32], strides = [1, 1]} : vector<2x128xf32> to vector<2x32xf32>
    %170 = math.tanh %169 : vector<2x32xf32>
    %171 = vector.extract_strided_slice %156 {offsets = [0, 96], sizes = [2, 32], strides = [1, 1]} : vector<2x128xf32> to vector<2x32xf32>
    %172 = arith.negf %171 : vector<2x32xf32>
    %173 = math.exp %172 : vector<2x32xf32>
    %cst_44 = arith.constant 1.000000e+00 : f32
    %174 = vector.broadcast %cst_44 : f32 to vector<2x32xf32>
    %175 = arith.addf %174, %173 : vector<2x32xf32>
    %176 = arith.divf %174, %175 : vector<2x32xf32>
    %177 = arith.mulf %168, %150 : vector<2x32xf32>
    %178 = arith.mulf %162, %170 : vector<2x32xf32>
    %179 = arith.addf %177, %178 : vector<2x32xf32>
    %180 = math.tanh %179 : vector<2x32xf32>
    %181 = arith.mulf %176, %180 : vector<2x32xf32>
    %182 = vector.extract_strided_slice %5 {offsets = [12, 0], sizes = [2, 128], strides = [1, 1]} : vector<16x128xf32> to vector<2x128xf32>
    %c0_45 = arith.constant 0 : index
    %c0_46 = arith.constant 0 : index
    %183 = vector.load %arg2[%c0_45, %c0_46] : memref<32x128xf32, #tpu.memory_space<vmem>>, vector<32x128xf32>
    %cst_47 = arith.constant dense<0.000000e+00> : vector<2x128xf32>
    %184 = tpu.matmul %181, %183, %cst_47 {dimension_numbers = #tpu.dot_dimension_numbers<[1], [0], [0], [1], [0, 0, 1, 1], [], []>} : vector<2x32xf32>, vector<32x128xf32>, vector<2x128xf32> -> vector<2x128xf32>
    %185 = arith.addf %182, %184 : vector<2x128xf32>
    %186 = vector.extract_strided_slice %185 {offsets = [0, 0], sizes = [2, 32], strides = [1, 1]} : vector<2x128xf32> to vector<2x32xf32>
    %187 = arith.negf %186 : vector<2x32xf32>
    %188 = math.exp %187 : vector<2x32xf32>
    %cst_48 = arith.constant 1.000000e+00 : f32
    %189 = vector.broadcast %cst_48 : f32 to vector<2x32xf32>
    %190 = arith.addf %189, %188 : vector<2x32xf32>
    %191 = arith.divf %189, %190 : vector<2x32xf32>
    %192 = vector.extract_strided_slice %185 {offsets = [0, 32], sizes = [2, 32], strides = [1, 1]} : vector<2x128xf32> to vector<2x32xf32>
    %193 = arith.negf %192 : vector<2x32xf32>
    %194 = math.exp %193 : vector<2x32xf32>
    %cst_49 = arith.constant 1.000000e+00 : f32
    %195 = vector.broadcast %cst_49 : f32 to vector<2x32xf32>
    %196 = arith.addf %195, %194 : vector<2x32xf32>
    %197 = arith.divf %195, %196 : vector<2x32xf32>
    %198 = vector.extract_strided_slice %185 {offsets = [0, 64], sizes = [2, 32], strides = [1, 1]} : vector<2x128xf32> to vector<2x32xf32>
    %199 = math.tanh %198 : vector<2x32xf32>
    %200 = vector.extract_strided_slice %185 {offsets = [0, 96], sizes = [2, 32], strides = [1, 1]} : vector<2x128xf32> to vector<2x32xf32>
    %201 = arith.negf %200 : vector<2x32xf32>
    %202 = math.exp %201 : vector<2x32xf32>
    %cst_50 = arith.constant 1.000000e+00 : f32
    %203 = vector.broadcast %cst_50 : f32 to vector<2x32xf32>
    %204 = arith.addf %203, %202 : vector<2x32xf32>
    %205 = arith.divf %203, %204 : vector<2x32xf32>
    %206 = arith.mulf %197, %179 : vector<2x32xf32>
    %207 = arith.mulf %191, %199 : vector<2x32xf32>
    %208 = arith.addf %206, %207 : vector<2x32xf32>
    %209 = math.tanh %208 : vector<2x32xf32>
    %210 = arith.mulf %205, %209 : vector<2x32xf32>
    %211 = vector.extract_strided_slice %5 {offsets = [14, 0], sizes = [2, 128], strides = [1, 1]} : vector<16x128xf32> to vector<2x128xf32>
    %c0_51 = arith.constant 0 : index
    %c0_52 = arith.constant 0 : index
    %212 = vector.load %arg2[%c0_51, %c0_52] : memref<32x128xf32, #tpu.memory_space<vmem>>, vector<32x128xf32>
    %cst_53 = arith.constant dense<0.000000e+00> : vector<2x128xf32>
    %213 = tpu.matmul %210, %212, %cst_53 {dimension_numbers = #tpu.dot_dimension_numbers<[1], [0], [0], [1], [0, 0, 1, 1], [], []>} : vector<2x32xf32>, vector<32x128xf32>, vector<2x128xf32> -> vector<2x128xf32>
    %214 = arith.addf %211, %213 : vector<2x128xf32>
    %215 = vector.extract_strided_slice %214 {offsets = [0, 0], sizes = [2, 32], strides = [1, 1]} : vector<2x128xf32> to vector<2x32xf32>
    %216 = arith.negf %215 : vector<2x32xf32>
    %217 = math.exp %216 : vector<2x32xf32>
    %cst_54 = arith.constant 1.000000e+00 : f32
    %218 = vector.broadcast %cst_54 : f32 to vector<2x32xf32>
    %219 = arith.addf %218, %217 : vector<2x32xf32>
    %220 = arith.divf %218, %219 : vector<2x32xf32>
    %221 = vector.extract_strided_slice %214 {offsets = [0, 32], sizes = [2, 32], strides = [1, 1]} : vector<2x128xf32> to vector<2x32xf32>
    %222 = arith.negf %221 : vector<2x32xf32>
    %223 = math.exp %222 : vector<2x32xf32>
    %cst_55 = arith.constant 1.000000e+00 : f32
    %224 = vector.broadcast %cst_55 : f32 to vector<2x32xf32>
    %225 = arith.addf %224, %223 : vector<2x32xf32>
    %226 = arith.divf %224, %225 : vector<2x32xf32>
    %227 = vector.extract_strided_slice %214 {offsets = [0, 64], sizes = [2, 32], strides = [1, 1]} : vector<2x128xf32> to vector<2x32xf32>
    %228 = math.tanh %227 : vector<2x32xf32>
    %229 = vector.extract_strided_slice %214 {offsets = [0, 96], sizes = [2, 32], strides = [1, 1]} : vector<2x128xf32> to vector<2x32xf32>
    %230 = arith.negf %229 : vector<2x32xf32>
    %231 = math.exp %230 : vector<2x32xf32>
    %cst_56 = arith.constant 1.000000e+00 : f32
    %232 = vector.broadcast %cst_56 : f32 to vector<2x32xf32>
    %233 = arith.addf %232, %231 : vector<2x32xf32>
    %234 = arith.divf %232, %233 : vector<2x32xf32>
    %235 = arith.mulf %226, %208 : vector<2x32xf32>
    %236 = arith.mulf %220, %228 : vector<2x32xf32>
    %237 = arith.addf %235, %236 : vector<2x32xf32>
    %238 = math.tanh %237 : vector<2x32xf32>
    %239 = arith.mulf %234, %238 : vector<2x32xf32>
    %240 = vector.extract_strided_slice %36 {offsets = [0, 0], sizes = [1, 32], strides = [1, 1]} : vector<2x32xf32> to vector<1x32xf32>
    %241 = vector.extract_strided_slice %65 {offsets = [0, 0], sizes = [1, 32], strides = [1, 1]} : vector<2x32xf32> to vector<1x32xf32>
    %242 = vector.extract_strided_slice %94 {offsets = [0, 0], sizes = [1, 32], strides = [1, 1]} : vector<2x32xf32> to vector<1x32xf32>
    %243 = vector.extract_strided_slice %123 {offsets = [0, 0], sizes = [1, 32], strides = [1, 1]} : vector<2x32xf32> to vector<1x32xf32>
    %244 = vector.extract_strided_slice %152 {offsets = [0, 0], sizes = [1, 32], strides = [1, 1]} : vector<2x32xf32> to vector<1x32xf32>
    %245 = vector.extract_strided_slice %181 {offsets = [0, 0], sizes = [1, 32], strides = [1, 1]} : vector<2x32xf32> to vector<1x32xf32>
    %246 = vector.extract_strided_slice %210 {offsets = [0, 0], sizes = [1, 32], strides = [1, 1]} : vector<2x32xf32> to vector<1x32xf32>
    %247 = vector.extract_strided_slice %239 {offsets = [0, 0], sizes = [1, 32], strides = [1, 1]} : vector<2x32xf32> to vector<1x32xf32>
    %248 = tpu.concatenate %240, %241, %242, %243, %244, %245, %246, %247 in 0 : vector<1x32xf32>, vector<1x32xf32>, vector<1x32xf32>, vector<1x32xf32>, vector<1x32xf32>, vector<1x32xf32>, vector<1x32xf32>, vector<1x32xf32> -> vector<8x32xf32>
    %249 = vector.extract_strided_slice %36 {offsets = [1, 0], sizes = [1, 32], strides = [1, 1]} : vector<2x32xf32> to vector<1x32xf32>
    %250 = vector.extract_strided_slice %65 {offsets = [1, 0], sizes = [1, 32], strides = [1, 1]} : vector<2x32xf32> to vector<1x32xf32>
    %251 = vector.extract_strided_slice %94 {offsets = [1, 0], sizes = [1, 32], strides = [1, 1]} : vector<2x32xf32> to vector<1x32xf32>
    %252 = vector.extract_strided_slice %123 {offsets = [1, 0], sizes = [1, 32], strides = [1, 1]} : vector<2x32xf32> to vector<1x32xf32>
    %253 = vector.extract_strided_slice %152 {offsets = [1, 0], sizes = [1, 32], strides = [1, 1]} : vector<2x32xf32> to vector<1x32xf32>
    %254 = vector.extract_strided_slice %181 {offsets = [1, 0], sizes = [1, 32], strides = [1, 1]} : vector<2x32xf32> to vector<1x32xf32>
    %255 = vector.extract_strided_slice %210 {offsets = [1, 0], sizes = [1, 32], strides = [1, 1]} : vector<2x32xf32> to vector<1x32xf32>
    %256 = vector.extract_strided_slice %239 {offsets = [1, 0], sizes = [1, 32], strides = [1, 1]} : vector<2x32xf32> to vector<1x32xf32>
    %257 = tpu.concatenate %249, %250, %251, %252, %253, %254, %255, %256 in 0 : vector<1x32xf32>, vector<1x32xf32>, vector<1x32xf32>, vector<1x32xf32>, vector<1x32xf32>, vector<1x32xf32>, vector<1x32xf32>, vector<1x32xf32> -> vector<8x32xf32>
    %258 = tpu.concatenate %248, %257 in 0 : vector<8x32xf32>, vector<8x32xf32> -> vector<16x32xf32>
    %c0_57 = arith.constant 0 : index
    %c0_58 = arith.constant 0 : index
    %259 = vector.load %arg6[%c0_57, %c0_58] : memref<16x32xf32, #tpu.memory_space<vmem>>, vector<16x32xf32>
    tpu.vector_store %arg6[%c0_57, %c0_58], %258 {strides = array<i32>} : memref<16x32xf32, #tpu.memory_space<vmem>>, vector<16x32xf32>,
    return
  }
}

module attributes {stable_mosaic.version = 11 : i64} {
  func.func @head_kernel(%arg0: memref<16x32xf32, #tpu.memory_space<vmem>>, %arg1: memref<3x32x8xf32, #tpu.memory_space<vmem>>, %arg2: memref<1x8xf32, #tpu.memory_space<vmem>>, %arg3: memref<1x8xf32, #tpu.memory_space<vmem>>, %arg4: memref<1x8xf32, #tpu.memory_space<vmem>>, %arg5: memref<8x8xf32, #tpu.memory_space<vmem>>, %arg6: memref<1x1xf32, #tpu.memory_space<vmem>>, %arg7: memref<2x1xf32, #tpu.memory_space<vmem>>) attributes {dimension_semantics = [], scalar_prefetch = 0 : i64, scratch_operands = 0 : i64, tpu.core_type = #tpu.core_type<tc>} {
    %cst = arith.constant 0.000000e+00 : f32
    %0 = vector.broadcast %cst : f32 to vector<1x8xf32>
    %c0 = arith.constant 0 : index
    %c0_0 = arith.constant 0 : index
    %1 = vector.load %arg0[%c0, %c0_0] : memref<16x32xf32, #tpu.memory_space<vmem>>, vector<8x32xf32>
    %c1 = arith.constant 1 : index
    %c0_1 = arith.constant 0 : index
    %c0_2 = arith.constant 0 : index
    %2 = vector.load %arg1[%c1, %c0_1, %c0_2] : memref<3x32x8xf32, #tpu.memory_space<vmem>>, vector<1x32x8xf32>
    %3 = vector.shape_cast %2 : vector<1x32x8xf32> to vector<32x8xf32>
    %cst_3 = arith.constant dense<0.000000e+00> : vector<8x8xf32>
    %4 = tpu.matmul %1, %3, %cst_3 {dimension_numbers = #tpu.dot_dimension_numbers<[1], [0], [0], [1], [0, 0, 1, 1], [], []>} : vector<8x32xf32>, vector<32x8xf32>, vector<8x8xf32> -> vector<8x8xf32>
    %5 = vector.extract_strided_slice %1 {offsets = [0, 0], sizes = [7, 32], strides = [1, 1]} : vector<8x32xf32> to vector<7x32xf32>
    %c0_4 = arith.constant 0 : index
    %c0_5 = arith.constant 0 : index
    %c0_6 = arith.constant 0 : index
    %6 = vector.load %arg1[%c0_4, %c0_5, %c0_6] : memref<3x32x8xf32, #tpu.memory_space<vmem>>, vector<1x32x8xf32>
    %7 = vector.shape_cast %6 : vector<1x32x8xf32> to vector<32x8xf32>
    %cst_7 = arith.constant dense<0.000000e+00> : vector<7x8xf32>
    %8 = tpu.matmul %5, %7, %cst_7 {dimension_numbers = #tpu.dot_dimension_numbers<[1], [0], [0], [1], [0, 0, 1, 1], [], []>} : vector<7x32xf32>, vector<32x8xf32>, vector<7x8xf32> -> vector<7x8xf32>
    %9 = vector.extract_strided_slice %1 {offsets = [1, 0], sizes = [7, 32], strides = [1, 1]} : vector<8x32xf32> to vector<7x32xf32>
    %c2 = arith.constant 2 : index
    %c0_8 = arith.constant 0 : index
    %c0_9 = arith.constant 0 : index
    %10 = vector.load %arg1[%c2, %c0_8, %c0_9] : memref<3x32x8xf32, #tpu.memory_space<vmem>>, vector<1x32x8xf32>
    %11 = vector.shape_cast %10 : vector<1x32x8xf32> to vector<32x8xf32>
    %cst_10 = arith.constant dense<0.000000e+00> : vector<7x8xf32>
    %12 = tpu.matmul %9, %11, %cst_10 {dimension_numbers = #tpu.dot_dimension_numbers<[1], [0], [0], [1], [0, 0, 1, 1], [], []>} : vector<7x32xf32>, vector<32x8xf32>, vector<7x8xf32> -> vector<7x8xf32>
    %13 = tpu.concatenate %0, %8 in 0 : vector<1x8xf32>, vector<7x8xf32> -> vector<8x8xf32>
    %14 = arith.addf %4, %13 : vector<8x8xf32>
    %15 = tpu.concatenate %12, %0 in 0 : vector<7x8xf32>, vector<1x8xf32> -> vector<8x8xf32>
    %16 = arith.addf %14, %15 : vector<8x8xf32>
    %c0_11 = arith.constant 0 : index
    %c0_12 = arith.constant 0 : index
    %17 = vector.load %arg2[%c0_11, %c0_12] : memref<1x8xf32, #tpu.memory_space<vmem>>, vector<1x8xf32>
    %18 = vector.broadcast %17 : vector<1x8xf32> to vector<8x8xf32>
    %19 = arith.addf %16, %18 : vector<8x8xf32>
    %c0_13 = arith.constant 0 : index
    %c0_14 = arith.constant 0 : index
    %20 = vector.load %arg3[%c0_13, %c0_14] : memref<1x8xf32, #tpu.memory_space<vmem>>, vector<1x8xf32>
    %21 = vector.broadcast %20 : vector<1x8xf32> to vector<8x8xf32>
    %22 = arith.mulf %19, %21 : vector<8x8xf32>
    %c0_15 = arith.constant 0 : index
    %c0_16 = arith.constant 0 : index
    %23 = vector.load %arg4[%c0_15, %c0_16] : memref<1x8xf32, #tpu.memory_space<vmem>>, vector<1x8xf32>
    %24 = vector.broadcast %23 : vector<1x8xf32> to vector<8x8xf32>
    %25 = arith.addf %22, %24 : vector<8x8xf32>
    %c0_17 = arith.constant 0 : index
    %c0_18 = arith.constant 0 : index
    %26 = vector.load %arg5[%c0_17, %c0_18] : memref<8x8xf32, #tpu.memory_space<vmem>>, vector<8x8xf32>
    %27 = arith.mulf %25, %26 : vector<8x8xf32>
    %cst_19 = arith.constant dense<0.000000e+00> : vector<8xf32>
    %28 = vector.multi_reduction <add>, %27, %cst_19 [1] : vector<8x8xf32> to vector<8xf32>
    %29 = vector.shape_cast %28 : vector<8xf32> to vector<8x1xf32>
    %cst_20 = arith.constant dense<0.000000e+00> : vector<1xf32>
    %30 = vector.multi_reduction <add>, %29, %cst_20 [0] : vector<8x1xf32> to vector<1xf32>
    %31 = vector.shape_cast %30 : vector<1xf32> to vector<1x1xf32>
    %c0_21 = arith.constant 0 : index
    %c0_22 = arith.constant 0 : index
    %32 = vector.load %arg6[%c0_21, %c0_22] : memref<1x1xf32, #tpu.memory_space<vmem>>, vector<1x1xf32>
    %33 = arith.addf %31, %32 : vector<1x1xf32>
    %cst_23 = arith.constant 0.000000e+00 : f32
    %34 = vector.broadcast %cst_23 : f32 to vector<1x1xf32>
    %35 = arith.maximumf %33, %34 : vector<1x1xf32>
    %c0_24 = arith.constant 0 : index
    %c0_25 = arith.constant 0 : index
    %36 = vector.load %arg7[%c0_24, %c0_25] : memref<2x1xf32, #tpu.memory_space<vmem>>, vector<1x1xf32>
    tpu.vector_store %arg7[%c0_24, %c0_25], %35 {strides = array<i32>} : memref<2x1xf32, #tpu.memory_space<vmem>>, vector<1x1xf32>,
    %c8 = arith.constant 8 : index
    %c0_26 = arith.constant 0 : index
    %37 = vector.load %arg0[%c8, %c0_26] : memref<16x32xf32, #tpu.memory_space<vmem>>, vector<8x32xf32>
    %c1_27 = arith.constant 1 : index
    %c0_28 = arith.constant 0 : index
    %c0_29 = arith.constant 0 : index
    %38 = vector.load %arg1[%c1_27, %c0_28, %c0_29] : memref<3x32x8xf32, #tpu.memory_space<vmem>>, vector<1x32x8xf32>
    %39 = vector.shape_cast %38 : vector<1x32x8xf32> to vector<32x8xf32>
    %cst_30 = arith.constant dense<0.000000e+00> : vector<8x8xf32>
    %40 = tpu.matmul %37, %39, %cst_30 {dimension_numbers = #tpu.dot_dimension_numbers<[1], [0], [0], [1], [0, 0, 1, 1], [], []>} : vector<8x32xf32>, vector<32x8xf32>, vector<8x8xf32> -> vector<8x8xf32>
    %41 = vector.extract_strided_slice %37 {offsets = [0, 0], sizes = [7, 32], strides = [1, 1]} : vector<8x32xf32> to vector<7x32xf32>
    %c0_31 = arith.constant 0 : index
    %c0_32 = arith.constant 0 : index
    %c0_33 = arith.constant 0 : index
    %42 = vector.load %arg1[%c0_31, %c0_32, %c0_33] : memref<3x32x8xf32, #tpu.memory_space<vmem>>, vector<1x32x8xf32>
    %43 = vector.shape_cast %42 : vector<1x32x8xf32> to vector<32x8xf32>
    %cst_34 = arith.constant dense<0.000000e+00> : vector<7x8xf32>
    %44 = tpu.matmul %41, %43, %cst_34 {dimension_numbers = #tpu.dot_dimension_numbers<[1], [0], [0], [1], [0, 0, 1, 1], [], []>} : vector<7x32xf32>, vector<32x8xf32>, vector<7x8xf32> -> vector<7x8xf32>
    %45 = vector.extract_strided_slice %37 {offsets = [1, 0], sizes = [7, 32], strides = [1, 1]} : vector<8x32xf32> to vector<7x32xf32>
    %c2_35 = arith.constant 2 : index
    %c0_36 = arith.constant 0 : index
    %c0_37 = arith.constant 0 : index
    %46 = vector.load %arg1[%c2_35, %c0_36, %c0_37] : memref<3x32x8xf32, #tpu.memory_space<vmem>>, vector<1x32x8xf32>
    %47 = vector.shape_cast %46 : vector<1x32x8xf32> to vector<32x8xf32>
    %cst_38 = arith.constant dense<0.000000e+00> : vector<7x8xf32>
    %48 = tpu.matmul %45, %47, %cst_38 {dimension_numbers = #tpu.dot_dimension_numbers<[1], [0], [0], [1], [0, 0, 1, 1], [], []>} : vector<7x32xf32>, vector<32x8xf32>, vector<7x8xf32> -> vector<7x8xf32>
    %49 = tpu.concatenate %0, %44 in 0 : vector<1x8xf32>, vector<7x8xf32> -> vector<8x8xf32>
    %50 = arith.addf %40, %49 : vector<8x8xf32>
    %51 = tpu.concatenate %48, %0 in 0 : vector<7x8xf32>, vector<1x8xf32> -> vector<8x8xf32>
    %52 = arith.addf %50, %51 : vector<8x8xf32>
    %c0_39 = arith.constant 0 : index
    %c0_40 = arith.constant 0 : index
    %53 = vector.load %arg2[%c0_39, %c0_40] : memref<1x8xf32, #tpu.memory_space<vmem>>, vector<1x8xf32>
    %54 = vector.broadcast %53 : vector<1x8xf32> to vector<8x8xf32>
    %55 = arith.addf %52, %54 : vector<8x8xf32>
    %c0_41 = arith.constant 0 : index
    %c0_42 = arith.constant 0 : index
    %56 = vector.load %arg3[%c0_41, %c0_42] : memref<1x8xf32, #tpu.memory_space<vmem>>, vector<1x8xf32>
    %57 = vector.broadcast %56 : vector<1x8xf32> to vector<8x8xf32>
    %58 = arith.mulf %55, %57 : vector<8x8xf32>
    %c0_43 = arith.constant 0 : index
    %c0_44 = arith.constant 0 : index
    %59 = vector.load %arg4[%c0_43, %c0_44] : memref<1x8xf32, #tpu.memory_space<vmem>>, vector<1x8xf32>
    %60 = vector.broadcast %59 : vector<1x8xf32> to vector<8x8xf32>
    %61 = arith.addf %58, %60 : vector<8x8xf32>
    %c0_45 = arith.constant 0 : index
    %c0_46 = arith.constant 0 : index
    %62 = vector.load %arg5[%c0_45, %c0_46] : memref<8x8xf32, #tpu.memory_space<vmem>>, vector<8x8xf32>
    %63 = arith.mulf %61, %62 : vector<8x8xf32>
    %cst_47 = arith.constant dense<0.000000e+00> : vector<8xf32>
    %64 = vector.multi_reduction <add>, %63, %cst_47 [1] : vector<8x8xf32> to vector<8xf32>
    %65 = vector.shape_cast %64 : vector<8xf32> to vector<8x1xf32>
    %cst_48 = arith.constant dense<0.000000e+00> : vector<1xf32>
    %66 = vector.multi_reduction <add>, %65, %cst_48 [0] : vector<8x1xf32> to vector<1xf32>
    %67 = vector.shape_cast %66 : vector<1xf32> to vector<1x1xf32>
    %c0_49 = arith.constant 0 : index
    %c0_50 = arith.constant 0 : index
    %68 = vector.load %arg6[%c0_49, %c0_50] : memref<1x1xf32, #tpu.memory_space<vmem>>, vector<1x1xf32>
    %69 = arith.addf %67, %68 : vector<1x1xf32>
    %cst_51 = arith.constant 0.000000e+00 : f32
    %70 = vector.broadcast %cst_51 : f32 to vector<1x1xf32>
    %71 = arith.maximumf %69, %70 : vector<1x1xf32>
    %c1_52 = arith.constant 1 : index
    %c0_53 = arith.constant 0 : index
    %72 = vector.load %arg7[%c1_52, %c0_53] : memref<2x1xf32, #tpu.memory_space<vmem>>, vector<1x1xf32>
    tpu.vector_store %arg7[%c1_52, %c0_53], %71 {strides = array<i32>} : memref<2x1xf32, #tpu.memory_space<vmem>>, vector<1x1xf32>,
    return
  }
}

</mosaic_0001>

<bundles_post_ra>
// kernel: generator_forward.5
= control target key start
LH: loop header
LB: loop body
LE: loop exit
PB: predicated region body
PF: predicated region fallthrough
CT: control target
= control target key end

     0   :  { %vm38_vm0 = vcmask 261120   ;;  %vm93_vm1 = vcmask 1040384   ;;  %vm115_vm2 = vcmask 1046528   ;;  %vm135_vm3 = vcmask 64512   ;;  %s415_s1 = inlined_call_operand.vmem [shape: f32[3,32,8], index: 1, kind: input, shape index: {}]   ;;  %s416_s0 = inlined_call_operand.vmem [shape: f32[16,32], index: 0, kind: input, shape index: {}]   ;;  %s417_s2 = inlined_call_operand.vmem [shape: f32[1,8], index: 2, kind: input, shape index: {}]   ;;  %s418_s3 = inlined_call_operand.vmem [shape: f32[1,8], index: 3, kind: input, shape index: {}]   ;;  %s419_s4 = inlined_call_operand.vmem [shape: f32[1,8], index: 4, kind: input, shape index: {}]   ;;  %s420_s6 = inlined_call_operand.<no memory space> [shape: f32[1,1], index: 6, kind: input, shape index: {}]   ;;  %s421_s5 = inlined_call_operand.vmem [shape: f32[8,8], index: 5, kind: input, shape index: {}]   ;;  %s422_s7 = inlined_call_operand.vmem [shape: f32[2,1], index: 7, kind: output, shape index: {}]  }
   0x1   :  { %v272_v0 = vld [vmem:[%s415_s1 + $0x38] sm:$0xff]  ;;  %v271_v1 = vld [vmem:[%s415_s1 + $0x30] sm:$0xff]  ;;  %v270_v5 = vld [vmem:[%s415_s1 + $0x28] sm:$0xff]  ;;  %v12_v16 = vstv %s420_s6  ;;  %vm148_vm4 = vcmask 0  }
   0x2   :  { %v37_v2 = vld [vmem:[%s415_s1 + $0x18] sm:$0xff]  ;;  %107 = vmatpush.msra.mxu2 %v272_v0  ;;  %v36_v3 = vld [vmem:[%s415_s1 + $0x10] sm:$0xff]  ;;  %v35_v6 = vld [vmem:[%s415_s1 + $0x8] sm:$0xff]  ;;  %13 = vst [vmem:[#allocation2] sm:$0x1] %v12_v16 }
   0x3   :  { %54 = vmatpush.msra.mxu0 %v37_v2  ;;  %v277_v4 = vld [vmem:[%s415_s1 + $0x58] sm:$0xff]  ;;  %174 = vmatpush.msra.mxu3 %v37_v2  ;;  %v276_v7 = vld [vmem:[%s415_s1 + $0x50] sm:$0xff]  ;;  %v275_v8 = vld [vmem:[%s415_s1 + $0x48] sm:$0xff] }
   0x4   :  { %82 = vmatpush.msra.mxu1 %v277_v4  ;;  %108 = vmatpush.msra.mxu2 %v271_v1  ;;  %v269_v9 = vld [vmem:[%s415_s1 + $0x20] sm:$0xff]  ;;  %v150_v14 = vld [vmem:[%s416_s0 + $0x8] sm:$0xff] }
   0x5   :  { %55 = vmatpush.msra.mxu0 %v36_v3  ;;  %175 = vmatpush.msra.mxu3 %v36_v3  ;;  %v34_v10 = vld [vmem:[%s415_s1] sm:$0xff]  ;;  %v186_v15 = vrot.slane %v150_v14, 1 }
   0x6   :  { %83 = vmatpush.msra.mxu1 %v276_v7  ;;  %109 = vmatpush.msra.mxu2 %v270_v5  ;;  %v28_v11 = vld [vmem:[%s416_s0] sm:$0xff] }
   0x7   :  { %56 = vmatpush.msra.mxu0 %v35_v6  ;;  %176 = vmatpush.msra.mxu3 %v35_v6  ;;  %v274_v12 = vld [vmem:[%s415_s1 + $0x40] sm:$0xff]  ;;  %v67_v13 = vrot.slane %v28_v11, 1 }
   0x8   :  { %84 = vmatpush.msra.mxu1 %v275_v8  ;;  %110 = vmatpush.msra.mxu2 %v269_v9  ;;  %v291_v24 = vld [vmem:[%s417_s2] ss:$0 sm:$0xff] }
   0x9   :  { %57 = vmatpush.msra.mxu0 %v34_v10  ;;  %279 = vmatmul.msk.f32.vlgmr.msra.gmra.mxu2 %vm38_vm0, %v28_v11  ;;  %v294_v28 = vld [vmem:[%s418_s3] ss:$0 sm:$0xff] }
   0xa   :  { %273 = vmatmul.msk.f32.vlgmr.msra.gmra.mxu0 %vm38_vm0, %v28_v11  ;;  %177 = vmatpush.msra.mxu3 %v34_v10  ;;  %v295_v34 = vld [vmem:[%s419_s4] ss:$0 sm:$0xff] }
   0xb   :  { %85 = vmatpush.msra.mxu1 %v274_v12  ;;  %284 = vmatmul.msk.f32.vlgmr.msra.gmra.mxu3 %vm38_vm0, %v150_v14  ;;  %v292_v36 = vld [vmem:[%s417_s2] ss:$0 sm:$0xff] }
   0xc   :  { %278 = vmatmul.msk.f32.vlgmr.msra.gmra.mxu1 %vm38_vm0, %v67_v13  ;;  %201 = vmatpush.msrb.mxu0 %v277_v4  ;;  %v293_v39 = vld [vmem:[%s418_s3] ss:$0 sm:$0xff] }
   0xd   :  { %225 = vmatpush.msrb.mxu1 %v272_v0  ;;  %v133_v40 = vld [vmem:[%s421_s5] sm:$0xff] }
   0xe   :  { %202 = vmatpush.msrb.mxu0 %v276_v7  ;;  %v296_v43 = vld [vmem:[%s419_s4] ss:$0 sm:$0xff] }
   0xf   :  { %226 = vmatpush.msrb.mxu1 %v271_v1  ;;  %v145_v58 = vld [vmem:[#allocation2] sm:$0x1] }
  0x10   :  { %203 = vmatpush.msrb.mxu0 %v275_v8  ;;  %v261_v2 = vld [vmem:[#allocation2] sm:$0x1] }
  0x11   :  { %227 = vmatpush.msrb.mxu1 %v270_v5 }
  0x12   :  { %204 = vmatpush.msrb.mxu0 %v274_v12 }
  0x13   :  { %228 = vmatpush.msrb.mxu1 %v269_v9  ;;  %289 = vmatmul.msk.f32.vlgmr.msrb.gmra.mxu0 %vm38_vm0, %v186_v15 }
  0x14   :  { %290 = vmatmul.msk.f32.vlgmr.msrb.gmra.mxu1 %vm38_vm0, %v150_v14 }
  0x87   :  { %v59_v17 = vpop.f32.mrf.mxu0 }
  0x88   :  { %v91_v18 = vrot.slane %v59_v17, 7 }
  0x89   :  { %v87_v19 = vpop.f32.mrf.mxu1 }
  0x8a   :  { %v94_v20 = vsel %vm93_vm1, 0.0, %v91_v18  ;;  %v116_v21 = vsel %vm115_vm2, %v87_v19, 0.0 }
  0x8c   :  { %v112_v22 = vpop.f32.mrf.mxu2 }
  0x8d   :  { %v113_v23 = vadd.f32 %v112_v22, %v94_v20 }
  0x8e   :  { %v179_v25 = vpop.f32.mrf.mxu3 }
  0x8f   :  { %v117_v26 = vadd.f32 %v116_v21, %v113_v23  ;;  %v210_v27 = vrot.slane %v179_v25, 7 }
  0x90   :  { %v206_v30 = vpop.f32.mrf.mxu0 }
  0x91   :  { %v230_v29 = vpop.f32.mrf.mxu1  ;;  %v122_v31 = vadd.f32 %v291_v24, %v117_v26  ;;  %v212_v32 = vsel %vm93_vm1, 0.0, %v210_v27  ;;  %v233_v33 = vsel %vm115_vm2, %v206_v30, 0.0 }
  0x92   :  { %v231_v35 = vadd.f32 %v230_v29, %v212_v32 }
  0x93   :  { %v127_v37 = vmul.f32 %v294_v28, %v122_v31 }
  0x94   :  { %v234_v38 = vadd.f32 %v233_v33, %v231_v35 }
  0x95   :  { %v132_v41 = vadd.f32 %v295_v34, %v127_v37 }
  0x96   :  { %v239_v42 = vadd.f32 %v292_v36, %v234_v38 }
  0x97   :  { %v134_v44 = vmul.f32 %v133_v40, %v132_v41 }
  0x98   :  { %v244_v45 = vmul.f32 %v293_v39, %v239_v42 }
  0x99   :  { %v136_v46 = vsel %vm135_vm3, %v134_v44, 0.0 }
  0x9a   :  { %137 = vadd.xlane.f32.xlu0 %v136_v46  ;;  %v249_v47 = vadd.f32 %v296_v43, %v244_v45 }
  0x9c   :  { %v251_v48 = vmul.f32 %v249_v47, %v133_v40 }
  0x9e   :  { %v252_v49 = vsel %vm135_vm3, %v251_v48, 0.0 }
  0xa2   :  { %253 = vadd.xlane.f32.xlu0 %v252_v49 }
 0x10d   :  { %v138_v50 = vpop.xlane.xlu0 %137 }
 0x10e   :  { %v139_v51 = vrot.slane %v138_v50, 4 }
 0x110   :  { %v140_v52 = vadd.f32 %v139_v51, %v138_v50 }
 0x112   :  { %v141_v53 = vrot.slane %v140_v52, 2 }
 0x114   :  { %v142_v54 = vadd.f32 %v141_v53, %v140_v52 }
 0x115   :  { %v254_v55 = vpop.xlane.xlu0 %253 }
 0x116   :  { %v143_v56 = vrot.slane %v142_v54, 1  ;;  %v255_v57 = vrot.slane %v254_v55, 4 }
 0x118   :  { %v144_v59 = vadd.f32 %v143_v56, %v142_v54  ;;  %v256_v60 = vadd.f32 %v255_v57, %v254_v55 }
 0x11a   :  { %v146_v61 = vadd.f32 %v145_v58, %v144_v59  ;;  %v257_v62 = vrot.slane %v256_v60, 2 }
 0x11c   :  { %v147_v63 = vmax.f32 %v146_v61, 0.0  ;;  %v258_v0 = vadd.f32 %v257_v62, %v256_v60 }
 0x11e   :  { %149 = vst.msk [vmem:[%s422_s7] sm:$0x1] %vm148_vm4, %v147_v63  ;;  %v259_v1 = vrot.slane %v258_v0, 1 }
 0x120   :  { %v260_v3 = vadd.f32 %v259_v1, %v258_v0 }
 0x122   :  { %v262_v4 = vadd.f32 %v261_v2, %v260_v3 }
 0x124   :  { %v263_v5 = vmax.f32 %v262_v4, 0.0 }
 0x126   :  { %264 = vst.msk [vmem:[%s422_s7 + $0x1] sm:$0x1] %vm148_vm4, %v263_v5 }

// kernel: generator_forward.4
= control target key start
LH: loop header
LB: loop body
LE: loop exit
PB: predicated region body
PF: predicated region fallthrough
CT: control target
= control target key end

     0   :  { %18 = vsyncpa [#allocation3], 0  ;;  %s734_s28 = smov [#allocation2]   ;;  %s735_s30 = smov 128   ;;  %s993_s0 = inlined_call_operand.vmem [shape: f32[16,32], index: 0, kind: input, shape index: {}]   ;;  %s994_s1 = inlined_call_operand.vmem [shape: f32[1,32], index: 1, kind: input, shape index: {}]   ;;  %s995_s2 = inlined_call_operand.vmem [shape: f32[1,32], index: 2, kind: input, shape index: {}]   ;;  %s996_s3 = inlined_call_operand.vmem [shape: f32[32,96], index: 3, kind: input, shape index: {}]   ;;  %s997_s4 = inlined_call_operand.vmem [shape: f32[1,96], index: 4, kind: input, shape index: {}]   ;;  %s998_s5 = inlined_call_operand.vmem [shape: f32[32,32], index: 5, kind: input, shape index: {}]   ;;  %s999_s6 = inlined_call_operand.vmem [shape: f32[1,32], index: 6, kind: input, shape index: {}]   ;;  %s1000_s7 = inlined_call_operand.vmem [shape: f32[1,32], index: 7, kind: input, shape index: {}]   ;;  %s1001_s8 = inlined_call_operand.vmem [shape: f32[1,32], index: 8, kind: input, shape index: {}]   ;;  %s1002_s9 = inlined_call_operand.hbm [shape: f32[32,64], index: 9, kind: input, shape index: {}]   ;;  %s1003_s10 = inlined_call_operand.vmem [shape: f32[1,64], index: 10, kind: input, shape index: {}]   ;;  %s1004_s11 = inlined_call_operand.vmem [shape: f32[64,32], index: 11, kind: input, shape index: {}]   ;;  %s1005_s12 = inlined_call_operand.vmem [shape: f32[1,32], index: 12, kind: input, shape index: {}]   ;;  %s1006_s13 = inlined_call_operand.vmem [shape: f32[16,32], index: 13, kind: output, shape index: {}]  }
   0x1   :  { %s41_s27 = sshll.u32 %s1002_s9, 4  ;;  %s43_s29 = sshll.u32 %s734_s28, 4  ;;  %s42_s27 = int_to_ptr.hbm [resolvable:$true] %s41_s27  ;;  %s44_s29 = int_to_ptr.vmem [resolvable:$true] %s43_s29 }
   0x2   :  { %s736_s14 = smov 8  }
   0x3   :  { %49 = dma.hbm_to_vmem [thread:$0]  %s42_s27, 512, %s44_s29, [#allocation3], %s735_s30, %s735_s30, %s736_s14  }
   0x4   :  { %732 = dma.done.wait [#allocation3], 512  }
   0x5   :  { %733 = vsyncadd [#allocation3], 4294966784  ;;  %vm64_vm0 = vcmask 261120   ;;  %v820_v0 = vld [vmem:[%s993_s0] sm:$0xff]  ;;  %v737_v2 = vmov 32.0   ;;  %v129_v14 = vld [vmem:[%s996_s3 + $0x18] sm:$0xff] }
   0x6   :  { %v65_v1 = vsel %vm64_vm0, %v820_v0, 0.0  ;;  %678 = vrcp.f32 %v737_v2  ;;  %152 = vmatpush.msra.mxu0 %v129_v14  ;;  %v128_v15 = vld [vmem:[%s996_s3 + $0x10] sm:$0xff]  ;;  %v127_v16 = vld [vmem:[%s996_s3 + $0x8] sm:$0xff]  ;;  %v126_v17 = vld [vmem:[%s996_s3] sm:$0xff]  ;;  %s739_s29 = smov 80   ;;  %vm166_vm5 = vcmask 130048  }
   0x7   :  { %66 = vadd.xlane.f32.xlu0 %v65_v1  ;;  %v670_v27 = vld [vmem:[%s994_s1] ss:$0 sm:$0xff]  ;;  %s738_s1 = smov 112   ;;  %v866_v36 = vld [vmem:[%s993_s0 + $0x8] sm:$0xff]  ;;  %vm192_vm6 = vcmask 64512   ;;  %s741_s0 = smov 48  }
   0x8   :  { %153 = vmatpush.msra.mxu0 %v128_v15  ;;  %v671_v30 = vld [vmem:[%s995_s2] ss:$0 sm:$0xff]  ;;  %s740_s2 = smov 96   ;;  %v68_v37 = vsel %vm64_vm0, %v866_v36, 0.0  ;;  %s743_s15 = smov 16   ;;  %vm601_vm13 = vcmask 523264  }
   0x9   :  { %v852_v33 = vld [vmem:[%s997_s4] ss:$0 sm:$0xff]  ;;  %s742_s4 = smov 64  }
   0xa   :  { %154 = vmatpush.msra.mxu0 %v127_v16 }
   0xc   :  { %v679_v3 = vpop.eup %678  ;;  %155 = vmatpush.msra.mxu0 %v126_v17 }
   0xd   :  { %v72_v4 = vmul.f32 32.0, %v679_v3  ;;  %vm76_vm1 = vweird.f32 %v679_v3 }
   0xf   :  { %v73_v5 = vsub.f32 1.0, %v72_v4 }
  0x11   :  { %v74_v6 = vmul.f32 %v679_v3, %v73_v5 }
  0x13   :  { %v75_v7 = vadd.f32 %v679_v3, %v74_v6 }
  0x15   :  { %v824_v8 = vsel %vm76_vm1, %v679_v3, %v75_v7 }
  0x7a   :  { %v67_v9 = vpop.xlane.xlu0 %66 }
  0x7b   :  { %v78_v10 = vmul.f32 %v824_v8, %v67_v9 }
  0x7d   :  { %v80_v11 = vsub.f32 %v820_v0, %v78_v10 }
  0x7f   :  { %v82_v12 = vmul.f32 %v80_v11, %v80_v11 }
  0x81   :  { %v84_v13 = vsel %vm64_vm0, %v82_v12, 0.0 }
  0x82   :  { %85 = vadd.xlane.f32.xlu0 %v84_v13 }
  0xf5   :  { %v86_v18 = vpop.xlane.xlu0 %85 }
  0xf6   :  { %v90_v19 = vmul.f32 %v86_v18, %v824_v8 }
  0xf8   :  { %v92_v20 = vadd.f32 1e-05, %v90_v19 }
  0xfa   :  { %680 = vrsqrt.f32 %v92_v20  ;;  %vm100_vm3 = vweird.f32 %v92_v20 }
 0x100   :  { %v681_v21 = vpop.eup %680 }
 0x101   :  { %v95_v22 = vmul.f32 %v681_v21, %v92_v20  ;;  %vm101_vm2 = vweird.f32 %v681_v21 }
 0x102   :  { %vm102_vm4 = vmor %vm100_vm3, %vm101_vm2 }
 0x103   :  { %v96_v23 = vmul.f32 %v681_v21, %v95_v22 }
 0x105   :  { %v97_v24 = vmul.f32 0.5, %v96_v23 }
 0x107   :  { %v98_v25 = vsub.f32 1.5, %v97_v24 }
 0x109   :  { %v99_v26 = vmul.f32 %v681_v21, %v98_v25 }
 0x10b   :  { %v103_v28 = vsel %vm102_vm4, %v681_v21, %v99_v26 }
 0x10c   :  { %v114_v29 = vmul.f32 %v103_v28, %v80_v11 }
 0x10e   :  { %v119_v31 = vmul.f32 %v670_v27, %v114_v29 }
 0x110   :  { %v124_v32 = vadd.f32 %v671_v30, %v119_v31 }
 0x112   :  { %640 = vmatmul.msk.f32.vlgmr.msra.gmra.mxu0 %vm64_vm0, %v124_v32 }
 0x18f   :  { %v157_v34 = vpop.f32.mrf.mxu0 }
 0x190   :  { %v855_v35 = vadd.f32 %v852_v33, %v157_v34 }
 0x192   :  { %230 = vrot.lane.b32.xlu2 %v855_v35, %s738_s1  ;;  %232 = vrot.lane.b32.xlu1 %v855_v35, %s739_s29 }
 0x19a   :  { %164 = vrot.lane.b32.xlu2 %v855_v35, %s740_s2 }
 0x1bc   :  { %69 = vadd.xlane.f32.xlu1 %v68_v37 }
 0x1ec   :  { %v231_v38 = vpop.permute.xlu2 %230 }
 0x1f4   :  { %v165_v39 = vpop.permute.xlu2 %164 }
 0x1f5   :  { %642 = vmatpush.xpose.msk.msra.mxu1 %vm166_vm5, %v165_v39 }
 0x1f8   :  { %643 = vmatmul.msk.f32.vlgmr.msra.gmra.mxu1 %vm166_vm5, %v855_v35 }
 0x204   :  { %v233_v40 = vpop.permute.xlu1 %232 }
 0x205   :  { %645 = vmatpush.xpose.msk.msra.mxu3 %vm166_vm5, %v233_v40 }
 0x208   :  { %646 = vmatmul.msk.f32.vlgmr.msra.gmra.mxu3 %vm166_vm5, %v231_v38 }
 0x22f   :  { %v70_v41 = vpop.xlane.xlu1 %69 }
 0x230   :  { %v79_v42 = vmul.f32 %v824_v8, %v70_v41 }
 0x232   :  { %v81_v43 = vsub.f32 %v866_v36, %v79_v42 }
 0x234   :  { %v83_v44 = vmul.f32 %v81_v43, %v81_v43 }
 0x236   :  { %v87_v45 = vsel %vm64_vm0, %v83_v44, 0.0 }
 0x237   :  { %88 = vadd.xlane.f32.xlu0 %v87_v45 }
 0x275   :  { %v188_v46 = vpop.f32.mrf.mxu1 }
 0x276   :  { %v191_v47 = vmul.f32 0.25, %v188_v46 }
 0x278   :  { %v193_v48 = vsel %vm192_vm6, %v191_v47, -inf }
 0x279   :  { %194 = vmax.xlane.f32.xlu0 %v193_v48 }
 0x28b   :  { %v255_v49 = vpop.f32.mrf.mxu3 }
 0x28c   :  { %v258_v50 = vmul.f32 0.25, %v255_v49 }
 0x28e   :  { %v259_v51 = vsel %vm192_vm6, %v258_v50, -inf }
 0x28f   :  { %260 = vmax.xlane.f32.xlu2 %v259_v51 }
 0x2aa   :  { %v89_v52 = vpop.xlane.xlu0 %88 }
 0x2ab   :  { %v91_v53 = vmul.f32 %v89_v52, %v824_v8  ;;  %v439_v52 = vld [vmem:[%s998_s5 + $0x10] sm:$0xff] }
 0x2ad   :  { %v93_v54 = vadd.f32 1e-05, %v91_v53 }
 0x2af   :  { %682 = vrsqrt.f32 %v93_v54  ;;  %vm110_vm8 = vweird.f32 %v93_v54 }
 0x2b5   :  { %v683_v55 = vpop.eup %682 }
 0x2b6   :  { %v105_v56 = vmul.f32 %v683_v55, %v93_v54  ;;  %vm111_vm7 = vweird.f32 %v683_v55 }
 0x2b7   :  { %vm112_vm9 = vmor %vm110_vm8, %vm111_vm7 }
 0x2b8   :  { %v106_v57 = vmul.f32 %v683_v55, %v105_v56  ;;  %v437_v56 = vld [vmem:[%s998_s5] sm:$0xff] }
 0x2ba   :  { %v107_v58 = vmul.f32 0.5, %v106_v57 }
 0x2bc   :  { %v108_v59 = vsub.f32 1.5, %v107_v58 }
 0x2be   :  { %v109_v60 = vmul.f32 %v683_v55, %v108_v59 }
 0x2c0   :  { %v113_v61 = vsel %vm112_vm9, %v683_v55, %v109_v60  ;;  %v438_v55 = vld [vmem:[%s998_s5 + $0x8] sm:$0xff] }
 0x2c1   :  { %v115_v62 = vmul.f32 %v113_v61, %v81_v43  ;;  %v673_v61 = vld [vmem:[%s999_s6] ss:$0 sm:$0xff] }
 0x2c3   :  { %v120_v63 = vmul.f32 %v670_v27, %v115_v62 }
 0x2c5   :  { %v125_v1 = vadd.f32 %v671_v30, %v120_v63 }
 0x2c7   :  { %641 = vmatmul.msk.f32.gmra.mxu0 %vm64_vm0, %v125_v1 }
 0x2ec   :  { %v195_v7 = vpop.xlane.xlu0 %194 }
 0x2ed   :  { %v196_v9 = vsub.f32 %v191_v47, %v195_v7 }
 0x2ef   :  { %v197_v10 = vmul.f32 1.442695, %v196_v9 }
 0x302   :  { %v261_v2 = vpop.xlane.xlu2 %260 }
 0x303   :  { %v262_v3 = vsub.f32 %v258_v50, %v261_v2  ;;  %v440_v50 = vld [vmem:[%s998_s5 + $0x18] sm:$0xff] }
 0x305   :  { %v263_v4 = vmul.f32 1.442695, %v262_v3 }
 0x307   :  { %684 = vpow2.f32 %v263_v4 }
 0x308   :  { %686 = vpow2.f32 %v197_v10 }
 0x30d   :  { %v685_v5 = vpop.eup %684 }
 0x30e   :  { %v265_v6 = vsel %vm192_vm6, %v685_v5, 0.0  ;;  %v687_v13 = vpop.eup %686 }
 0x30f   :  { %266 = vadd.xlane.f32.xlu0 %v265_v6  ;;  %v199_v14 = vsel %vm192_vm6, %v687_v13, 0.0 }
 0x323   :  { %270 = vrot.lane.b32.xlu0 %v855_v35, %s741_s0 }
 0x344   :  { %v160_v11 = vpop.f32.mrf.mxu0 }
 0x345   :  { %v161_v12 = vadd.f32 %v852_v33, %v160_v11 }
 0x347   :  { %366 = vrot.lane.b32.xlu2 %v161_v12, %s738_s1  ;;  %368 = vrot.lane.b32.xlu1 %v161_v12, %s739_s29 }
 0x34d   :  { %200 = vadd.xlane.f32.xlu0 %v199_v14  ;;  %v537_v14 = vld [vmem:[#allocation2 + $0x18] sm:$0xff] }
 0x34e   :  { %560 = vmatpush.msrb.mxu0 %v537_v14 }
 0x34f   :  { %302 = vrot.lane.b32.xlu2 %v161_v12, %s740_s2  ;;  %204 = vrot.lane.b32.xlu1 %v855_v35, %s742_s4 }
 0x361   :  { %406 = vrot.lane.b32.xlu0 %v161_v12, %s741_s0 }
 0x382   :  { %v267_v15 = vpop.xlane.xlu0 %266 }
 0x383   :  { %688 = vrcp.f32 %v267_v15  ;;  %v536_v15 = vld [vmem:[#allocation2 + $0x10] sm:$0xff] }
 0x384   :  { %561 = vmatpush.msrb.mxu0 %v536_v15 }
 0x389   :  { %v689_v16 = vpop.eup %688 }
 0x38a   :  { %v269_v18 = vmul.f32 %v689_v16, %v685_v5  ;;  %v535_v16 = vld [vmem:[#allocation2 + $0x8] sm:$0xff] }
 0x38b   :  { %562 = vmatpush.msrb.mxu0 %v535_v16 }
 0x395   :  { %v271_v17 = vpop.permute.xlu0 %270 }
 0x396   :  { %291 = vmatpush.msra.mxu2 %v271_v17  ;;  %v534_v17 = vld [vmem:[#allocation2] sm:$0xff] }
 0x397   :  { %647 = vmatmul.msk.f32.vlgmr.msra.gmra.mxu2 %vm192_vm6, %v269_v18  ;;  %563 = vmatpush.msrb.mxu0 %v534_v17 }
 0x3a1   :  { %v367_v19 = vpop.permute.xlu2 %366 }
 0x3a9   :  { %v303_v23 = vpop.permute.xlu2 %302 }
 0x3b9   :  { %v369_v20 = vpop.permute.xlu1 %368 }
 0x3ba   :  { %651 = vmatpush.xpose.msk.msrb.mxu2 %vm166_vm5, %v369_v20 }
 0x3bd   :  { %652 = vmatmul.msk.f32.vlgmr.msrb.gmra.mxu2 %vm166_vm5, %v367_v19 }
 0x3c0   :  { %v201_v21 = vpop.xlane.xlu0 %200 }
 0x3c1   :  { %690 = vrcp.f32 %v201_v21  ;;  %v205_v22 = vpop.permute.xlu1 %204 }
 0x3c2   :  { %225 = vmatpush.msrb.mxu1 %v205_v22 }
 0x3c4   :  { %648 = vmatpush.xpose.msk.msra.mxu1 %vm166_vm5, %v303_v23 }
 0x3c7   :  { %v691_v24 = vpop.eup %690 }
 0x3c8   :  { %v203_v25 = vmul.f32 %v691_v24, %v687_v13 }
 0x3ca   :  { %644 = vmatmul.msk.f32.vlgmr.msrb.gmra.mxu1 %vm192_vm6, %v203_v25 }
 0x3d2   :  { %649 = vmatmul.msk.f32.vlgmr.msra.gmra.mxu1 %vm166_vm5, %v161_v12 }
 0x3d3   :  { %v407_v26 = vpop.permute.xlu0 %406 }
 0x3d4   :  { %427 = vmatpush.msrb.mxu1 %v407_v26  ;;  %v674_v26 = vld [vmem:[%s1000_s7] ss:$0 sm:$0xff] }
 0x41a   :  { %v293_v27 = vpop.f32.mrf.mxu2 }
 0x440   :  { %v391_v28 = vpop.f32.mrf.mxu2 }
 0x441   :  { %v394_v29 = vmul.f32 0.25, %v391_v28 }
 0x443   :  { %v395_v30 = vsel %vm192_vm6, %v394_v29, -inf }
 0x444   :  { %396 = vmax.xlane.f32.xlu1 %v395_v30 }
 0x447   :  { %v227_v31 = vpop.f32.mrf.mxu1 }
 0x44f   :  { %v325_v32 = vpop.f32.mrf.mxu1 }
 0x450   :  { %v328_v33 = vmul.f32 0.25, %v325_v32 }
 0x452   :  { %v329_v34 = vsel %vm192_vm6, %v328_v33, -inf }
 0x453   :  { %330 = vmax.xlane.f32.xlu2 %v329_v34 }
 0x46b   :  { %297 = vrot.lane.b32.xlu2 %v293_v27, %s743_s15 }
 0x4b7   :  { %v397_v35 = vpop.xlane.xlu1 %396 }
 0x4b8   :  { %v398_v37 = vsub.f32 %v394_v29, %v397_v35  ;;  %v675_v29 = vld [vmem:[%s1001_s8] ss:$0 sm:$0xff] }
 0x4ba   :  { %v399_v38 = vmul.f32 1.442695, %v398_v37 }
 0x4bc   :  { %692 = vpow2.f32 %v399_v38  ;;  %v596_v38 = vld [vmem:[%s1004_s11 + $0x38] sm:$0xff] }
 0x4bd   :  { %616 = vmatpush.msra.mxu2 %v596_v38 }
 0x4c2   :  { %v693_v39 = vpop.eup %692 }
 0x4c3   :  { %v401_v40 = vsel %vm192_vm6, %v693_v39, 0.0 }
 0x4c4   :  { %402 = vadd.xlane.f32.xlu0 %v401_v40  ;;  %v594_v40 = vld [vmem:[%s1004_s11 + $0x28] sm:$0xff] }
 0x4c6   :  { %v331_v41 = vpop.xlane.xlu2 %330 }
 0x4c7   :  { %v332_v42 = vsub.f32 %v328_v33, %v331_v41  ;;  %v593_v41 = vld [vmem:[%s1004_s11 + $0x20] sm:$0xff] }
 0x4c9   :  { %v333_v43 = vmul.f32 1.442695, %v332_v42  ;;  %v592_v42 = vld [vmem:[%s1004_s11 + $0x18] sm:$0xff] }
 0x4cb   :  { %694 = vpow2.f32 %v333_v43  ;;  %v591_v43 = vld [vmem:[%s1004_s11 + $0x10] sm:$0xff] }
 0x4ce   :  { %v298_v57 = vpop.permute.xlu2 %297 }
 0x4cf   :  { %v300_v58 = vsel %vm166_vm5, %v227_v31, %v298_v57 }
 0x4d1   :  { %v695_v44 = vpop.eup %694 }
 0x4d2   :  { %v335_v45 = vsel %vm192_vm6, %v695_v44, 0.0 }
 0x4d3   :  { %336 = vadd.xlane.f32.xlu1 %v335_v45  ;;  %v589_v45 = vld [vmem:[%s1004_s11] sm:$0xff] }
 0x4d8   :  { %340 = vrot.lane.b32.xlu0 %v161_v12, %s742_s4 }
 0x537   :  { %v403_v46 = vpop.xlane.xlu0 %402 }
 0x538   :  { %696 = vrcp.f32 %v403_v46  ;;  %v676_v46 = vld [vmem:[%s1003_s10] ss:$0 sm:$0xff] }
 0x53e   :  { %v697_v47 = vpop.eup %696 }
 0x53f   :  { %v405_v48 = vmul.f32 %v697_v47, %v693_v39  ;;  %v595_v39 = vld [vmem:[%s1004_s11 + $0x30] sm:$0xff] }
 0x540   :  { %617 = vmatpush.msra.mxu2 %v595_v39 }
 0x541   :  { %653 = vmatmul.msk.f32.vlgmr.msrb.gmra.mxu1 %vm192_vm6, %v405_v48 }
 0x542   :  { %618 = vmatpush.msra.mxu2 %v594_v40 }
 0x544   :  { %619 = vmatpush.msra.mxu2 %v593_v41 }
 0x546   :  { %v337_v49 = vpop.xlane.xlu1 %336  ;;  %620 = vmatpush.msra.mxu2 %v592_v42 }
 0x547   :  { %698 = vrcp.f32 %v337_v49 }
 0x548   :  { %621 = vmatpush.msra.mxu2 %v591_v43 }
 0x54a   :  { %v341_v51 = vpop.permute.xlu0 %340 }
 0x54b   :  { %361 = vmatpush.msrb.mxu3 %v341_v51 }
 0x54d   :  { %459 = vmatpush.msra.mxu3 %v440_v50  ;;  %v699_v53 = vpop.eup %698 }
 0x54e   :  { %v339_v54 = vmul.f32 %v699_v53, %v695_v44  ;;  %v590_v44 = vld [vmem:[%s1004_s11 + $0x8] sm:$0xff] }
 0x54f   :  { %460 = vmatpush.msra.mxu3 %v439_v52  ;;  %622 = vmatpush.msra.mxu2 %v590_v44 }
 0x550   :  { %650 = vmatmul.msk.f32.vlgmr.msrb.gmra.mxu3 %vm192_vm6, %v339_v54 }
 0x551   :  { %461 = vmatpush.msra.mxu3 %v438_v55  ;;  %623 = vmatpush.msra.mxu2 %v589_v45 }
 0x553   :  { %462 = vmatpush.msra.mxu3 %v437_v56 }
 0x558   :  { %654 = vmatmul.msk.f32.vlgmr.msra.gmra.mxu3 %vm64_vm0, %v300_v58 }
 0x5be   :  { %v429_v59 = vpop.f32.mrf.mxu1 }
 0x5bf   :  { %433 = vrot.lane.b32.xlu1 %v429_v59, %s743_s15 }
 0x5d3   :  { %v363_v60 = vpop.f32.mrf.mxu3 }
 0x5db   :  { %v464_v62 = vpop.f32.mrf.mxu3 }
 0x5dc   :  { %v470_v63 = vadd.f32 %v464_v62, %v820_v0 }
 0x5de   :  { %v924_v1 = vadd.f32 %v673_v61, %v470_v63 }
 0x5e0   :  { %v480_v2 = vsel %vm64_vm0, %v924_v1, 0.0 }
 0x5e1   :  { %481 = vadd.xlane.f32.xlu0 %v480_v2 }
 0x631   :  { %v434_v3 = vpop.permute.xlu1 %433 }
 0x632   :  { %v436_v4 = vsel %vm166_vm5, %v363_v60, %v434_v3 }
 0x633   :  { %655 = vmatmul.msk.f32.gmra.mxu3 %vm64_vm0, %v436_v4 }
 0x654   :  { %v482_v5 = vpop.xlane.xlu0 %481 }
 0x655   :  { %v486_v6 = vmul.f32 %v482_v5, %v824_v8 }
 0x657   :  { %v488_v7 = vsub.f32 %v924_v1, %v486_v6 }
 0x659   :  { %v490_v9 = vmul.f32 %v488_v7, %v488_v7 }
 0x65b   :  { %v492_v10 = vsel %vm64_vm0, %v490_v9, 0.0 }
 0x65c   :  { %493 = vadd.xlane.f32.xlu1 %v492_v10 }
 0x6b6   :  { %v467_v0 = vpop.f32.mrf.mxu3 }
 0x6b7   :  { %v471_v11 = vadd.f32 %v467_v0, %v866_v36 }
 0x6b9   :  { %v934_v12 = vadd.f32 %v673_v61, %v471_v11 }
 0x6bb   :  { %v483_v13 = vsel %vm64_vm0, %v934_v12, 0.0 }
 0x6bc   :  { %484 = vadd.xlane.f32.xlu2 %v483_v13 }
 0x6cf   :  { %v494_v18 = vpop.xlane.xlu1 %493 }
 0x6d0   :  { %v498_v19 = vmul.f32 %v494_v18, %v824_v8 }
 0x6d2   :  { %v500_v20 = vadd.f32 1e-05, %v498_v19 }
 0x6d4   :  { %700 = vrsqrt.f32 %v500_v20  ;;  %vm508_vm11 = vweird.f32 %v500_v20 }
 0x6da   :  { %v701_v36 = vpop.eup %700 }
 0x6db   :  { %v503_v21 = vmul.f32 %v701_v36, %v500_v20  ;;  %vm509_vm10 = vweird.f32 %v701_v36 }
 0x6dc   :  { %vm510_vm12 = vmor %vm508_vm11, %vm509_vm10 }
 0x6dd   :  { %v504_v22 = vmul.f32 %v701_v36, %v503_v21 }
 0x6df   :  { %v505_v23 = vmul.f32 0.5, %v504_v22 }
 0x6e1   :  { %v506_v24 = vsub.f32 1.5, %v505_v23 }
 0x6e3   :  { %v507_v25 = vmul.f32 %v701_v36, %v506_v24 }
 0x6e5   :  { %v511_v27 = vsel %vm510_vm12, %v701_v36, %v507_v25 }
 0x6e6   :  { %v522_v28 = vmul.f32 %v511_v27, %v488_v7 }
 0x6e8   :  { %v527_v30 = vmul.f32 %v674_v26, %v522_v28 }
 0x6ea   :  { %v532_v31 = vadd.f32 %v675_v29, %v527_v30 }
 0x6ec   :  { %656 = vmatmul.msk.f32.vlgmr.msrb.gmra.mxu0 %vm64_vm0, %v532_v31 }
 0x72f   :  { %v485_v32 = vpop.xlane.xlu2 %484 }
 0x730   :  { %v487_v33 = vmul.f32 %v485_v32, %v824_v8 }
 0x732   :  { %v489_v34 = vsub.f32 %v934_v12, %v487_v33 }
 0x734   :  { %v491_v35 = vmul.f32 %v489_v34, %v489_v34 }
 0x736   :  { %v495_v37 = vsel %vm64_vm0, %v491_v35, 0.0 }
 0x737   :  { %496 = vadd.xlane.f32.xlu0 %v495_v37 }
 0x769   :  { %v565_v47 = vpop.f32.mrf.mxu0 }
 0x76a   :  { %v566_v48 = vadd.f32 %v676_v46, %v565_v47 }
 0x76c   :  { %v571_v49 = vmul.f32 %v566_v48, %v566_v48 }
 0x76e   :  { %v573_v50 = vmul.f32 %v571_v49, %v566_v48 }
 0x770   :  { %v575_v51 = vmul.f32 0.044715, %v573_v50 }
 0x772   :  { %v577_v52 = vadd.f32 %v575_v51, %v566_v48 }
 0x774   :  { %v579_v53 = vmul.f32 0.7978846, %v577_v52 }
 0x776   :  { %702 = vtanh.f32 %v579_v53 }
 0x77c   :  { %v703_v54 = vpop.eup %702 }
 0x77d   :  { %v583_v55 = vadd.f32 1.0, %v703_v54 }
 0x77f   :  { %v585_v56 = vmul.f32 0.5, %v583_v55 }
 0x781   :  { %v587_v57 = vmul.f32 %v585_v56, %v566_v48 }
 0x783   :  { %658 = vmatmul.msk.f32.vlgmr.msra.gmra.mxu2 %vm601_vm13, %v587_v57 }
 0x7aa   :  { %v497_v58 = vpop.xlane.xlu0 %496 }
 0x7ab   :  { %v499_v59 = vmul.f32 %v497_v58, %v824_v8  ;;  %v677_v8 = vld [vmem:[%s1005_s12] ss:$0 sm:$0xff] }
 0x7ad   :  { %v501_v60 = vadd.f32 1e-05, %v499_v59 }
 0x7af   :  { %704 = vrsqrt.f32 %v501_v60  ;;  %vm518_vm15 = vweird.f32 %v501_v60 }
 0x7b5   :  { %v705_v61 = vpop.eup %704 }
 0x7b6   :  { %v513_v62 = vmul.f32 %v705_v61, %v501_v60  ;;  %vm519_vm14 = vweird.f32 %v705_v61 }
 0x7b7   :  { %vm520_vm1 = vmor %vm518_vm15, %vm519_vm14 }
 0x7b8   :  { %v514_v63 = vmul.f32 %v705_v61, %v513_v62 }
 0x7ba   :  { %v515_v2 = vmul.f32 0.5, %v514_v63 }
 0x7bc   :  { %v516_v3 = vsub.f32 1.5, %v515_v2 }
 0x7be   :  { %v517_v4 = vmul.f32 %v705_v61, %v516_v3 }
 0x7c0   :  { %v521_v5 = vsel %vm520_vm1, %v705_v61, %v517_v4 }
 0x7c1   :  { %v523_v6 = vmul.f32 %v521_v5, %v489_v34 }
 0x7c3   :  { %v528_v7 = vmul.f32 %v674_v26, %v523_v6 }
 0x7c5   :  { %v533_v9 = vadd.f32 %v675_v29, %v528_v7 }
 0x7c7   :  { %657 = vmatmul.msk.f32.gmra.mxu0 %vm64_vm0, %v533_v9 }
 0x806   :  { %v625_v10 = vpop.f32.mrf.mxu2 }
 0x807   :  { %v626_v0 = vadd.f32 %v677_v8, %v625_v10 }
 0x809   :  { %v631_v11 = vadd.f32 %v626_v0, %v924_v1 }
 0x80b   :  { %633 = vst.msk [vmem:[%s1006_s13] sm:$0xff] %vm64_vm0, %v631_v11 }
 0x844   :  { %v568_v13 = vpop.f32.mrf.mxu0 }
 0x845   :  { %v569_v14 = vadd.f32 %v676_v46, %v568_v13 }
 0x847   :  { %v572_v15 = vmul.f32 %v569_v14, %v569_v14 }
 0x849   :  { %v574_v16 = vmul.f32 %v572_v15, %v569_v14 }
 0x84b   :  { %v576_v17 = vmul.f32 0.044715, %v574_v16 }
 0x84d   :  { %v578_v18 = vadd.f32 %v576_v17, %v569_v14 }
 0x84f   :  { %v580_v19 = vmul.f32 0.7978846, %v578_v18 }
 0x851   :  { %706 = vtanh.f32 %v580_v19 }
 0x857   :  { %v707_v20 = vpop.eup %706 }
 0x858   :  { %v584_v36 = vadd.f32 1.0, %v707_v20 }
 0x85a   :  { %v586_v21 = vmul.f32 0.5, %v584_v36 }
 0x85c   :  { %v588_v22 = vmul.f32 %v586_v21, %v569_v14 }
 0x85e   :  { %659 = vmatmul.msk.f32.gmra.mxu2 %vm601_vm13, %v588_v22 }
 0x8e1   :  { %v628_v1 = vpop.f32.mrf.mxu2 }
 0x8e2   :  { %v629_v23 = vadd.f32 %v677_v8, %v628_v1 }
 0x8e4   :  { %v632_v24 = vadd.f32 %v629_v23, %v934_v12 }
 0x8e6   :  { %634 = vst.msk [vmem:[%s1006_s13 + $0x8] sm:$0xff] %vm64_vm0, %v632_v24 }
 0x8e7   :  { %639 = vsyncpa [#allocation3], 1 }

// kernel: generator_forward.3
= control target key start
LH: loop header
LB: loop body
LE: loop exit
PB: predicated region body
PF: predicated region fallthrough
CT: control target
= control target key end

     0   :  { %11 = vsyncpa [#allocation3], 0  ;;  %s995_s0 = inlined_call_operand.vmem [shape: f32[16,4], index: 0, kind: input, shape index: {}]   ;;  %s996_s1 = inlined_call_operand.vmem [shape: f32[4,128], index: 1, kind: input, shape index: {}]   ;;  %s997_s2 = inlined_call_operand.hbm [shape: f32[32,128], index: 2, kind: input, shape index: {}]   ;;  %s998_s3 = inlined_call_operand.hbm [shape: f32[1,128], index: 3, kind: input, shape index: {}]   ;;  %s999_s4 = inlined_call_operand.vmem [shape: f32[2,32], index: 4, kind: input, shape index: {}]   ;;  %s1000_s5 = inlined_call_operand.vmem [shape: f32[2,32], index: 5, kind: input, shape index: {}]   ;;  %s1001_s6 = inlined_call_operand.vmem [shape: f32[16,32], index: 6, kind: output, shape index: {}]  }
   0x1   :  { %s21_s23 = sshll.u32 %s997_s2, 4  ;;  %s22_s23 = int_to_ptr.hbm [resolvable:$true] %s21_s23 }
   0x2   :  { %12 = vsyncpa [#allocation5], 0  ;;  %s857_s24 = smov [#allocation2]   ;;  %s35_s28 = sshll.u32 %s998_s3, 4  ;;  %s36_s28 = int_to_ptr.hbm [resolvable:$true] %s35_s28 }
   0x3   :  { %s23_s25 = sshll.u32 %s857_s24, 4  ;;  %s858_s29 = smov 128   ;;  %s24_s25 = int_to_ptr.vmem [resolvable:$true] %s23_s25 }
   0x4   :  { %s859_s30 = smov 8   ;;  %s860_s7 = smov [#allocation4]  }
   0x5   :  { %29 = dma.hbm_to_vmem [thread:$0]  %s22_s23, 512, %s24_s25, [#allocation3], %s858_s29, %s858_s29, %s859_s30  }
   0x6   :  { %s37_s8 = sshll.u32 %s860_s7, 4  ;;  %s38_s8 = int_to_ptr.vmem [resolvable:$true] %s37_s8 }
   0x7   :  { %40 = dma.hbm_to_vmem [thread:$0]  %s36_s28, 16, %s38_s8, [#allocation5]  }
   0x8   :  { %853 = dma.done.wait [#allocation3], 512  }
   0x9   :  { %854 = vsyncadd [#allocation3], 4294966784 }
   0xa   :  { %855 = dma.done.wait [#allocation5], 16  }
   0xb   :  { %856 = vsyncadd [#allocation5], 4294967280  ;;  %vm67_vm0 = vcmask 1043456   ;;  %vm60_vm1 = vcmask 31744   ;;  %v99_v0 = vld [vmem:[#allocation2 + $0x18] sm:$0xff]  ;;  %v98_v1 = vld [vmem:[#allocation2 + $0x10] sm:$0xff] }
   0xc   :  { %v55_v2 = vld [vmem:[%s996_s1] sm:$0xf]  ;;  %116 = vmatpush.msra.mxu1 %v99_v0  ;;  %v97_v4 = vld [vmem:[#allocation2 + $0x8] sm:$0xff]  ;;  %183 = vmatpush.msra.mxu2 %v99_v0  ;;  %vm100_vm2 = vcmask 261120   ;;  %s861_s1 = smov 64   ;;  %s862_s14 = smov 32  }
   0xd   :  { %715 = vmatpush.msk.msra.mxu0 %vm67_vm0, %v55_v2  ;;  %v53_v3 = vld [vmem:[%s995_s0] sm:$0xff]  ;;  %253 = vmatpush.msra.mxu3 %v99_v0  ;;  %vm666_vm15 = vcmask 1040384  }
   0xe   :  { %716 = vmatmul.msk.f32.vlgmr.msra.gmra.mxu0 %vm60_vm1, %v53_v3  ;;  %117 = vmatpush.msra.mxu1 %v98_v1  ;;  %v96_v5 = vld [vmem:[#allocation2] sm:$0xff] }
   0xf   :  { %184 = vmatpush.msra.mxu2 %v98_v1  ;;  %529 = vmatpush.msrb.mxu0 %v99_v0  ;;  %v94_v6 = vld [vmem:[%s999_s4] sm:$0x3] }
  0x10   :  { %118 = vmatpush.msra.mxu1 %v97_v4  ;;  %254 = vmatpush.msra.mxu3 %v98_v1  ;;  %v916_v7 = vld [vmem:[#allocation4] ss:$0 sm:$0xff] }
  0x11   :  { %185 = vmatpush.msra.mxu2 %v97_v4  ;;  %530 = vmatpush.msrb.mxu0 %v98_v1  ;;  %v95_v13 = vld [vmem:[%s1000_s5] sm:$0x3] }
  0x12   :  { %119 = vmatpush.msra.mxu1 %v96_v5  ;;  %255 = vmatpush.msra.mxu3 %v97_v4 }
  0x13   :  { %718 = vmatmul.msk.f32.vlgmr.msra.gmra.mxu1 %vm100_vm2, %v94_v6  ;;  %186 = vmatpush.msra.mxu2 %v96_v5 }
  0x14   :  { %256 = vmatpush.msra.mxu3 %v96_v5  ;;  %323 = vmatpush.msrb.mxu1 %v99_v0 }
  0x15   :  { %393 = vmatpush.msrb.mxu2 %v99_v0  ;;  %531 = vmatpush.msrb.mxu0 %v97_v4 }
  0x16   :  { %459 = vmatpush.msrb.mxu3 %v99_v0  ;;  %324 = vmatpush.msrb.mxu1 %v98_v1 }
  0x17   :  { %394 = vmatpush.msrb.mxu2 %v98_v1  ;;  %532 = vmatpush.msrb.mxu0 %v96_v5 }
  0x18   :  { %460 = vmatpush.msrb.mxu3 %v98_v1  ;;  %325 = vmatpush.msrb.mxu1 %v97_v4 }
  0x19   :  { %395 = vmatpush.msrb.mxu2 %v97_v4 }
  0x1a   :  { %461 = vmatpush.msrb.mxu3 %v97_v4  ;;  %326 = vmatpush.msrb.mxu1 %v96_v5 }
  0x1b   :  { %396 = vmatpush.msrb.mxu2 %v96_v5 }
  0x1c   :  { %462 = vmatpush.msrb.mxu3 %v96_v5  ;;  %599 = vmatpush.msra.mxu1 %v99_v0 }
  0x1e   :  { %600 = vmatpush.msra.mxu1 %v98_v1 }
  0x20   :  { %601 = vmatpush.msra.mxu1 %v97_v4 }
  0x22   :  { %602 = vmatpush.msra.mxu1 %v96_v5 }
  0x8b   :  { %v88_v8 = vpop.f32.mrf.mxu0 }
  0x8c   :  { %v919_v9 = vadd.f32 %v916_v7, %v88_v8 }
  0x90   :  { %v121_v10 = vpop.f32.mrf.mxu1 }
  0x91   :  { %v124_v11 = vadd.f32 %v121_v10, %v919_v9 }
  0x93   :  { %741 = vtanh.f32 %v124_v11  ;;  %v719_v14 = vmul.f32 -1.442695, %v124_v11 }
  0x95   :  { %743 = vpow2.f32 %v719_v14 }
  0x99   :  { %v742_v12 = vpop.eup %741 }
  0x9a   :  { %151 = vrot.lane.b32.xlu0 %v742_v12, %s861_s1 }
  0x9b   :  { %v744_v15 = vpop.eup %743 }
  0x9c   :  { %v128_v16 = vadd.f32 1.0, %v744_v15 }
  0x9e   :  { %745 = vrcp.f32 %v128_v16  ;;  %v140_v22 = vand.u32 2147483648, %v128_v16  ;;  %vm134_vm4 = vweird.f32 %v128_v16  ;;  %v138_v23 = vand.u32 2147483647, %v128_v16 }
  0xa0   :  { %v141_v25 = vor.u32 1.1754944e-38, %v140_v22  ;;  %vm139_vm6 = vcmp.eq.f32.partialorder %v138_v23, 8.507059e+37 }
  0xa2   :  { %146 = vrot.lane.b32.xlu0 %v95_v13, %s862_s14 }
  0xa4   :  { %v746_v17 = vpop.eup %745 }
  0xa5   :  { %v130_v18 = vmul.f32 %v746_v17, %v128_v16  ;;  %vm135_vm3 = vweird.f32 %v746_v17 }
  0xa6   :  { %vm136_vm5 = vmor %vm134_vm4, %vm135_vm3  ;;  %vm668_vm3 = vcmask 1041408  }
  0xa7   :  { %v131_v19 = vsub.f32 1.0, %v130_v18 }
  0xa9   :  { %v132_v20 = vmul.f32 %v746_v17, %v131_v19 }
  0xab   :  { %v133_v21 = vadd.f32 %v746_v17, %v132_v20 }
  0xad   :  { %v137_v24 = vsel %vm136_vm5, %v746_v17, %v133_v21 }
  0xae   :  { %v142_v27 = vsel %vm139_vm6, %v141_v25, %v137_v24 }
 0x10c   :  { %v152_v26 = vpop.permute.xlu0 %151 }
 0x10d   :  { %v154_v28 = vmul.f32 %v152_v26, %v142_v27 }
 0x10f   :  { %156 = vrot.lane.b32.xlu1 %v154_v28, %s862_s14 }
 0x114   :  { %v147_v29 = vpop.permute.xlu0 %146 }
 0x115   :  { %v149_v30 = vmul.f32 %v147_v29, %v142_v27 }
 0x181   :  { %v157_v31 = vpop.permute.xlu1 %156 }
 0x182   :  { %v159_v32 = vadd.f32 %v157_v31, %v149_v30 }
 0x184   :  { %747 = vtanh.f32 %v159_v32  ;;  %v216_v56 = vrot.slane %v159_v32, 6 }
 0x18a   :  { %v748_v33 = vpop.eup %747 }
 0x18b   :  { %162 = vrot.lane.b32.xlu1 %v748_v33, %s861_s1 }
 0x1fd   :  { %v163_v34 = vpop.permute.xlu1 %162 }
 0x1fe   :  { %v929_v35 = vmul.f32 %v163_v34, %v142_v27 }
 0x200   :  { %167 = vrot.lane.b32.xlu2 %v929_v35, %s862_s14  ;;  %v679_v30 = vrot.slane %v929_v35, 1 }
 0x25a   :  { %v168_v36 = vpop.permute.xlu2 %167 }
 0x25b   :  { %720 = vmatmul.msk.f32.vlgmr.msra.gmra.mxu2 %vm100_vm2, %v168_v36 }
 0x2de   :  { %v188_v37 = vpop.f32.mrf.mxu2 }
 0x2df   :  { %v192_v38 = vrot.slane %v188_v37, 6 }
 0x2e1   :  { %v194_v39 = vadd.f32 %v192_v38, %v919_v9 }
 0x2e3   :  { %749 = vtanh.f32 %v194_v39  ;;  %v721_v41 = vmul.f32 -1.442695, %v194_v39 }
 0x2e5   :  { %751 = vpow2.f32 %v721_v41 }
 0x2e9   :  { %v750_v40 = vpop.eup %749 }
 0x2ea   :  { %220 = vrot.lane.b32.xlu2 %v750_v40, %s861_s1 }
 0x2eb   :  { %v752_v42 = vpop.eup %751 }
 0x2ec   :  { %v198_v43 = vadd.f32 1.0, %v752_v42 }
 0x2ee   :  { %753 = vrcp.f32 %v198_v43  ;;  %v210_v49 = vand.u32 2147483648, %v198_v43  ;;  %vm204_vm8 = vweird.f32 %v198_v43  ;;  %v208_v50 = vand.u32 2147483647, %v198_v43 }
 0x2f0   :  { %v211_v52 = vor.u32 1.1754944e-38, %v210_v49  ;;  %vm209_vm10 = vcmp.eq.f32.partialorder %v208_v50, 8.507059e+37 }
 0x2f4   :  { %v754_v44 = vpop.eup %753 }
 0x2f5   :  { %v200_v45 = vmul.f32 %v754_v44, %v198_v43  ;;  %vm205_vm7 = vweird.f32 %v754_v44 }
 0x2f6   :  { %vm206_vm9 = vmor %vm204_vm8, %vm205_vm7  ;;  %vm670_vm8 = vcmask 1042432  }
 0x2f7   :  { %v201_v46 = vsub.f32 1.0, %v200_v45 }
 0x2f9   :  { %v202_v47 = vmul.f32 %v754_v44, %v201_v46 }
 0x2fb   :  { %v203_v48 = vadd.f32 %v754_v44, %v202_v47 }
 0x2fd   :  { %v207_v51 = vsel %vm206_vm9, %v754_v44, %v203_v48 }
 0x2fe   :  { %v212_v54 = vsel %vm209_vm10, %v211_v52, %v207_v51 }
 0x2ff   :  { %v218_v57 = vmul.f32 %v216_v56, %v212_v54 }
 0x344   :  { %v221_v53 = vpop.permute.xlu2 %220 }
 0x345   :  { %v223_v55 = vmul.f32 %v221_v53, %v212_v54 }
 0x347   :  { %225 = vrot.lane.b32.xlu0 %v223_v55, %s862_s14 }
 0x3b9   :  { %v226_v58 = vpop.permute.xlu0 %225 }
 0x3ba   :  { %v228_v59 = vadd.f32 %v226_v58, %v218_v57 }
 0x3bc   :  { %755 = vtanh.f32 %v228_v59  ;;  %v286_v22 = vrot.slane %v228_v59, 6 }
 0x3c2   :  { %v756_v60 = vpop.eup %755 }
 0x3c3   :  { %231 = vrot.lane.b32.xlu1 %v756_v60, %s861_s1 }
 0x435   :  { %v232_v61 = vpop.permute.xlu1 %231 }
 0x436   :  { %v234_v62 = vmul.f32 %v232_v61, %v212_v54 }
 0x438   :  { %v236_v63 = vrot.slane %v234_v62, 2  ;;  %v651_v27 = vrot.slane %v234_v62, 1 }
 0x43a   :  { %237 = vrot.lane.b32.xlu2 %v236_v63, %s862_s14  ;;  %v667_v34 = vsel %vm666_vm15, %v929_v35, %v651_v27  ;;  %v692_v36 = vsel %vm666_vm15, %v679_v30, %v236_v63  ;;  %vm673_vm15 = vcmask 1044480  }
 0x494   :  { %v238_v0 = vpop.permute.xlu2 %237 }
 0x495   :  { %722 = vmatmul.msk.f32.vlgmr.msra.gmra.mxu3 %vm100_vm2, %v238_v0 }
 0x518   :  { %v258_v1 = vpop.f32.mrf.mxu3 }
 0x519   :  { %v262_v2 = vrot.slane %v258_v1, 4 }
 0x51b   :  { %v264_v3 = vadd.f32 %v262_v2, %v919_v9 }
 0x51d   :  { %757 = vtanh.f32 %v264_v3  ;;  %v723_v5 = vmul.f32 -1.442695, %v264_v3 }
 0x51f   :  { %759 = vpow2.f32 %v723_v5  ;;  %v54_v5 = vld [vmem:[%s995_s0 + $0x8] sm:$0xff] }
 0x520   :  { %717 = vmatmul.msk.f32.gmra.mxu0 %vm60_vm1, %v54_v5 }
 0x523   :  { %v758_v4 = vpop.eup %757 }
 0x524   :  { %290 = vrot.lane.b32.xlu0 %v758_v4, %s861_s1 }
 0x525   :  { %v760_v6 = vpop.eup %759 }
 0x526   :  { %v268_v8 = vadd.f32 1.0, %v760_v6 }
 0x528   :  { %761 = vrcp.f32 %v268_v8  ;;  %v280_v15 = vand.u32 2147483648, %v268_v8  ;;  %vm274_vm12 = vweird.f32 %v268_v8  ;;  %v278_v16 = vand.u32 2147483647, %v268_v8 }
 0x52a   :  { %v281_v18 = vor.u32 1.1754944e-38, %v280_v15  ;;  %vm279_vm14 = vcmp.eq.f32.partialorder %v278_v16, 8.507059e+37 }
 0x52e   :  { %v762_v10 = vpop.eup %761 }
 0x52f   :  { %v270_v11 = vmul.f32 %v762_v10, %v268_v8  ;;  %vm275_vm11 = vweird.f32 %v762_v10 }
 0x530   :  { %vm276_vm13 = vmor %vm274_vm12, %vm275_vm11 }
 0x531   :  { %v271_v12 = vsub.f32 1.0, %v270_v11 }
 0x533   :  { %v272_v13 = vmul.f32 %v762_v10, %v271_v12 }
 0x535   :  { %v273_v14 = vadd.f32 %v762_v10, %v272_v13 }
 0x537   :  { %v277_v17 = vsel %vm276_vm13, %v762_v10, %v273_v14 }
 0x538   :  { %v282_v20 = vsel %vm279_vm14, %v281_v18, %v277_v17 }
 0x539   :  { %v288_v23 = vmul.f32 %v286_v22, %v282_v20 }
 0x596   :  { %v291_v19 = vpop.permute.xlu0 %290 }
 0x597   :  { %v293_v21 = vmul.f32 %v291_v19, %v282_v20 }
 0x599   :  { %295 = vrot.lane.b32.xlu1 %v293_v21, %s862_s14 }
 0x59d   :  { %v91_v8 = vpop.f32.mrf.mxu0 }
 0x59e   :  { %v959_v10 = vadd.f32 %v916_v7, %v91_v8 }
 0x60b   :  { %v296_v24 = vpop.permute.xlu1 %295 }
 0x60c   :  { %v298_v25 = vadd.f32 %v296_v24, %v288_v23 }
 0x60e   :  { %763 = vtanh.f32 %v298_v25  ;;  %v356_v57 = vrot.slane %v298_v25, 6 }
 0x614   :  { %v764_v26 = vpop.eup %763 }
 0x615   :  { %301 = vrot.lane.b32.xlu2 %v764_v26, %s861_s1 }
 0x66f   :  { %v302_v28 = vpop.permute.xlu2 %301 }
 0x670   :  { %v304_v29 = vmul.f32 %v302_v28, %v282_v20 }
 0x672   :  { %v653_v31 = vrot.slane %v304_v29, 2  ;;  %v682_v32 = vrot.slane %v304_v29, 3  ;;  %v306_v33 = vrot.slane %v304_v29, 4 }
 0x674   :  { %v669_v37 = vsel %vm668_vm3, %v667_v34, %v653_v31  ;;  %v693_v38 = vsel %vm668_vm3, %v692_v36, %v682_v32  ;;  %307 = vrot.lane.b32.xlu0 %v306_v33, %s862_s14 }
 0x6e6   :  { %v308_v39 = vpop.permute.xlu0 %307 }
 0x6e7   :  { %724 = vmatmul.msk.f32.vlgmr.msrb.gmra.mxu1 %vm100_vm2, %v308_v39 }
 0x764   :  { %v328_v40 = vpop.f32.mrf.mxu1 }
 0x765   :  { %v332_v41 = vrot.slane %v328_v40, 2 }
 0x767   :  { %v334_v42 = vadd.f32 %v332_v41, %v919_v9 }
 0x769   :  { %765 = vtanh.f32 %v334_v42  ;;  %v725_v44 = vmul.f32 -1.442695, %v334_v42 }
 0x76b   :  { %767 = vpow2.f32 %v725_v44 }
 0x76f   :  { %v766_v43 = vpop.eup %765 }
 0x770   :  { %360 = vrot.lane.b32.xlu1 %v766_v43, %s861_s1 }
 0x771   :  { %v768_v45 = vpop.eup %767 }
 0x772   :  { %v338_v35 = vadd.f32 1.0, %v768_v45 }
 0x774   :  { %769 = vrcp.f32 %v338_v35  ;;  %v350_v51 = vand.u32 2147483648, %v338_v35  ;;  %vm344_vm5 = vweird.f32 %v338_v35  ;;  %v348_v52 = vand.u32 2147483647, %v338_v35 }
 0x776   :  { %v351_v53 = vor.u32 1.1754944e-38, %v350_v51  ;;  %vm349_vm7 = vcmp.eq.f32.partialorder %v348_v52, 8.507059e+37 }
 0x77a   :  { %v770_v46 = vpop.eup %769 }
 0x77b   :  { %v340_v47 = vmul.f32 %v770_v46, %v338_v35  ;;  %vm345_vm4 = vweird.f32 %v770_v46 }
 0x77c   :  { %vm346_vm6 = vmor %vm344_vm5, %vm345_vm4 }
 0x77d   :  { %v341_v48 = vsub.f32 1.0, %v340_v47 }
 0x77f   :  { %v342_v49 = vmul.f32 %v770_v46, %v341_v48 }
 0x781   :  { %v343_v50 = vadd.f32 %v770_v46, %v342_v49 }
 0x783   :  { %v347_v9 = vsel %vm346_vm6, %v770_v46, %v343_v50 }
 0x784   :  { %v352_v55 = vsel %vm349_vm7, %v351_v53, %v347_v9  ;;  %vm675_vm7 = vcmask 1045504  }
 0x785   :  { %v358_v58 = vmul.f32 %v356_v57, %v352_v55 }
 0x7e2   :  { %v361_v54 = vpop.permute.xlu1 %360 }
 0x7e3   :  { %v363_v56 = vmul.f32 %v361_v54, %v352_v55 }
 0x7e5   :  { %365 = vrot.lane.b32.xlu2 %v363_v56, %s862_s14 }
 0x83f   :  { %v366_v59 = vpop.permute.xlu2 %365 }
 0x840   :  { %v368_v60 = vadd.f32 %v366_v59, %v358_v58 }
 0x842   :  { %771 = vtanh.f32 %v368_v60  ;;  %v423_v28 = vrot.slane %v368_v60, 6 }
 0x848   :  { %v772_v61 = vpop.eup %771 }
 0x849   :  { %371 = vrot.lane.b32.xlu0 %v772_v61, %s861_s1 }
 0x8bb   :  { %v372_v62 = vpop.permute.xlu0 %371 }
 0x8bc   :  { %v374_v63 = vmul.f32 %v372_v62, %v352_v55 }
 0x8be   :  { %v655_v0 = vrot.slane %v374_v63, 3  ;;  %v684_v1 = vrot.slane %v374_v63, 4  ;;  %v376_v2 = vrot.slane %v374_v63, 6 }
 0x8c0   :  { %v671_v3 = vsel %vm670_vm8, %v669_v37, %v655_v0  ;;  %v694_v4 = vsel %vm670_vm8, %v693_v38, %v684_v1  ;;  %377 = vrot.lane.b32.xlu1 %v376_v2, %s862_s14 }
 0x932   :  { %v378_v6 = vpop.permute.xlu1 %377 }
 0x933   :  { %726 = vmatmul.msk.f32.vlgmr.msrb.gmra.mxu2 %vm100_vm2, %v378_v6 }
 0x9b6   :  { %v398_v11 = vpop.f32.mrf.mxu2 }
 0x9b7   :  { %v401_v12 = vadd.f32 %v398_v11, %v959_v10 }
 0x9b9   :  { %773 = vtanh.f32 %v401_v12  ;;  %v727_v14 = vmul.f32 -1.442695, %v401_v12 }
 0x9bb   :  { %775 = vpow2.f32 %v727_v14 }
 0x9bf   :  { %v774_v13 = vpop.eup %773 }
 0x9c0   :  { %427 = vrot.lane.b32.xlu2 %v774_v13, %s861_s1 }
 0x9c1   :  { %v776_v15 = vpop.eup %775 }
 0x9c2   :  { %v405_v16 = vadd.f32 1.0, %v776_v15 }
 0x9c4   :  { %777 = vrcp.f32 %v405_v16  ;;  %v417_v7 = vand.u32 2147483648, %v405_v16  ;;  %vm411_vm9 = vweird.f32 %v405_v16  ;;  %v415_v22 = vand.u32 2147483647, %v405_v16 }
 0x9c6   :  { %v418_v24 = vor.u32 1.1754944e-38, %v417_v7  ;;  %vm416_vm11 = vcmp.eq.f32.partialorder %v415_v22, 8.507059e+37 }
 0x9ca   :  { %v778_v17 = vpop.eup %777 }
 0x9cb   :  { %v407_v18 = vmul.f32 %v778_v17, %v405_v16  ;;  %vm412_vm1 = vweird.f32 %v778_v17 }
 0x9cc   :  { %vm413_vm10 = vmor %vm411_vm9, %vm412_vm1 }
 0x9cd   :  { %v408_v19 = vsub.f32 1.0, %v407_v18 }
 0x9cf   :  { %v409_v20 = vmul.f32 %v778_v17, %v408_v19 }
 0x9d1   :  { %v410_v21 = vadd.f32 %v778_v17, %v409_v20 }
 0x9d3   :  { %v414_v23 = vsel %vm413_vm10, %v778_v17, %v410_v21 }
 0x9d4   :  { %v419_v26 = vsel %vm416_vm11, %v418_v24, %v414_v23  ;;  %vm677_vm11 = vcmask 1046528  }
 0x9d5   :  { %v425_v29 = vmul.f32 %v423_v28, %v419_v26 }
 0xa1a   :  { %v428_v25 = vpop.permute.xlu2 %427 }
 0xa1b   :  { %v430_v27 = vmul.f32 %v428_v25, %v419_v26 }
 0xa1d   :  { %432 = vrot.lane.b32.xlu0 %v430_v27, %s862_s14 }
 0xa8f   :  { %v433_v30 = vpop.permute.xlu0 %432 }
 0xa90   :  { %v435_v31 = vadd.f32 %v433_v30, %v425_v29 }
 0xa92   :  { %779 = vtanh.f32 %v435_v31  ;;  %v492_v58 = vrot.slane %v435_v31, 6 }
 0xa98   :  { %v780_v32 = vpop.eup %779 }
 0xa99   :  { %438 = vrot.lane.b32.xlu1 %v780_v32, %s861_s1 }
 0xb0b   :  { %v439_v33 = vpop.permute.xlu1 %438 }
 0xb0c   :  { %v441_v34 = vmul.f32 %v439_v33, %v419_v26 }
 0xb0e   :  { %v657_v36 = vrot.slane %v441_v34, 4  ;;  %v686_v37 = vrot.slane %v441_v34, 5  ;;  %443 = vrot.lane.b32.xlu2 %v441_v34, %s862_s14 }
 0xb10   :  { %v695_v38 = vsel %vm67_vm0, %v694_v4, %v686_v37  ;;  %v672_v39 = vsel %vm67_vm0, %v671_v3, %v657_v36 }
 0xb68   :  { %v444_v40 = vpop.permute.xlu2 %443 }
 0xb69   :  { %728 = vmatmul.msk.f32.vlgmr.msrb.gmra.mxu3 %vm100_vm2, %v444_v40 }
 0xbec   :  { %v464_v41 = vpop.f32.mrf.mxu3 }
 0xbed   :  { %v468_v42 = vrot.slane %v464_v41, 6 }
 0xbef   :  { %v470_v43 = vadd.f32 %v468_v42, %v959_v10 }
 0xbf1   :  { %781 = vtanh.f32 %v470_v43  ;;  %v729_v45 = vmul.f32 -1.442695, %v470_v43 }
 0xbf3   :  { %783 = vpow2.f32 %v729_v45 }
 0xbf7   :  { %v782_v44 = vpop.eup %781 }
 0xbf8   :  { %496 = vrot.lane.b32.xlu0 %v782_v44, %s861_s1 }
 0xbf9   :  { %v784_v35 = vpop.eup %783 }
 0xbfa   :  { %v474_v46 = vadd.f32 1.0, %v784_v35 }
 0xbfc   :  { %785 = vrcp.f32 %v474_v46  ;;  %v486_v52 = vand.u32 2147483648, %v474_v46  ;;  %vm480_vm12 = vweird.f32 %v474_v46  ;;  %v484_v9 = vand.u32 2147483647, %v474_v46 }
 0xbfe   :  { %v487_v54 = vor.u32 1.1754944e-38, %v486_v52  ;;  %vm485_vm14 = vcmp.eq.f32.partialorder %v484_v9, 8.507059e+37 }
 0xc02   :  { %v786_v47 = vpop.eup %785 }
 0xc03   :  { %v476_v48 = vmul.f32 %v786_v47, %v474_v46  ;;  %vm481_vm0 = vweird.f32 %v786_v47 }
 0xc04   :  { %vm482_vm13 = vmor %vm480_vm12, %vm481_vm0 }
 0xc05   :  { %v477_v49 = vsub.f32 1.0, %v476_v48 }
 0xc07   :  { %v478_v50 = vmul.f32 %v786_v47, %v477_v49 }
 0xc09   :  { %v479_v51 = vadd.f32 %v786_v47, %v478_v50 }
 0xc0b   :  { %v483_v53 = vsel %vm482_vm13, %v786_v47, %v479_v51 }
 0xc0c   :  { %v488_v56 = vsel %vm485_vm14, %v487_v54, %v483_v53 }
 0xc0d   :  { %v494_v59 = vmul.f32 %v492_v58, %v488_v56 }
 0xc6a   :  { %v497_v55 = vpop.permute.xlu0 %496 }
 0xc6b   :  { %v499_v57 = vmul.f32 %v497_v55, %v488_v56 }
 0xc6d   :  { %501 = vrot.lane.b32.xlu1 %v499_v57, %s862_s14 }
 0xcdf   :  { %v502_v60 = vpop.permute.xlu1 %501 }
 0xce0   :  { %v504_v61 = vadd.f32 %v502_v60, %v494_v59 }
 0xce2   :  { %787 = vtanh.f32 %v504_v61  ;;  %v562_v28 = vrot.slane %v504_v61, 6 }
 0xce8   :  { %v788_v62 = vpop.eup %787 }
 0xce9   :  { %507 = vrot.lane.b32.xlu2 %v788_v62, %s861_s1 }
 0xd43   :  { %v508_v63 = vpop.permute.xlu2 %507 }
 0xd44   :  { %v510_v0 = vmul.f32 %v508_v63, %v488_v56 }
 0xd46   :  { %v659_v1 = vrot.slane %v510_v0, 5  ;;  %v688_v2 = vrot.slane %v510_v0, 6  ;;  %v512_v3 = vrot.slane %v510_v0, 2 }
 0xd48   :  { %513 = vrot.lane.b32.xlu0 %v512_v3, %s862_s14  ;;  %v696_v4 = vsel %vm673_vm15, %v695_v38, %v688_v2  ;;  %v674_v5 = vsel %vm673_vm15, %v672_v39, %v659_v1 }
 0xdba   :  { %v514_v6 = vpop.permute.xlu0 %513 }
 0xdbb   :  { %730 = vmatmul.msk.f32.vlgmr.msrb.gmra.mxu0 %vm100_vm2, %v514_v6 }
 0xe38   :  { %v534_v8 = vpop.f32.mrf.mxu0 }
 0xe39   :  { %v538_v11 = vrot.slane %v534_v8, 4 }
 0xe3b   :  { %v540_v12 = vadd.f32 %v538_v11, %v959_v10 }
 0xe3d   :  { %789 = vtanh.f32 %v540_v12  ;;  %v731_v14 = vmul.f32 -1.442695, %v540_v12 }
 0xe3f   :  { %791 = vpow2.f32 %v731_v14 }
 0xe43   :  { %v790_v13 = vpop.eup %789 }
 0xe44   :  { %566 = vrot.lane.b32.xlu1 %v790_v13, %s861_s1 }
 0xe45   :  { %v792_v15 = vpop.eup %791 }
 0xe46   :  { %v544_v16 = vadd.f32 1.0, %v792_v15 }
 0xe48   :  { %793 = vrcp.f32 %v544_v16  ;;  %v556_v7 = vand.u32 2147483648, %v544_v16  ;;  %vm550_vm4 = vweird.f32 %v544_v16  ;;  %v554_v22 = vand.u32 2147483647, %v544_v16 }
 0xe4a   :  { %v557_v24 = vor.u32 1.1754944e-38, %v556_v7  ;;  %vm555_vm6 = vcmp.eq.f32.partialorder %v554_v22, 8.507059e+37 }
 0xe4e   :  { %v794_v17 = vpop.eup %793 }
 0xe4f   :  { %v546_v18 = vmul.f32 %v794_v17, %v544_v16  ;;  %vm551_vm3 = vweird.f32 %v794_v17 }
 0xe50   :  { %vm552_vm5 = vmor %vm550_vm4, %vm551_vm3 }
 0xe51   :  { %v547_v19 = vsub.f32 1.0, %v546_v18 }
 0xe53   :  { %v548_v20 = vmul.f32 %v794_v17, %v547_v19 }
 0xe55   :  { %v549_v21 = vadd.f32 %v794_v17, %v548_v20 }
 0xe57   :  { %v553_v23 = vsel %vm552_vm5, %v794_v17, %v549_v21 }
 0xe58   :  { %v558_v26 = vsel %vm555_vm6, %v557_v24, %v553_v23 }
 0xe59   :  { %v564_v29 = vmul.f32 %v562_v28, %v558_v26 }
 0xeb6   :  { %v567_v25 = vpop.permute.xlu1 %566 }
 0xeb7   :  { %v569_v27 = vmul.f32 %v567_v25, %v558_v26 }
 0xeb9   :  { %571 = vrot.lane.b32.xlu2 %v569_v27, %s862_s14 }
 0xf13   :  { %v572_v30 = vpop.permute.xlu2 %571 }
 0xf14   :  { %v574_v31 = vadd.f32 %v572_v30, %v564_v29 }
 0xf16   :  { %795 = vtanh.f32 %v574_v31  ;;  %v632_v58 = vrot.slane %v574_v31, 6 }
 0xf1c   :  { %v796_v32 = vpop.eup %795 }
 0xf1d   :  { %577 = vrot.lane.b32.xlu0 %v796_v32, %s861_s1 }
 0xf8f   :  { %v578_v33 = vpop.permute.xlu0 %577 }
 0xf90   :  { %v580_v34 = vmul.f32 %v578_v33, %v558_v26 }
 0xf92   :  { %v661_v36 = vrot.slane %v580_v34, 6  ;;  %v690_v37 = vrot.slane %v580_v34, 7  ;;  %v582_v38 = vrot.slane %v580_v34, 4 }
 0xf94   :  { %583 = vrot.lane.b32.xlu1 %v582_v38, %s862_s14  ;;  %v697_v39 = vsel %vm675_vm7, %v696_v4, %v690_v37  ;;  %v676_v40 = vsel %vm675_vm7, %v674_v5, %v661_v36 }
0x1006   :  { %v584_v41 = vpop.permute.xlu1 %583 }
0x1007   :  { %732 = vmatmul.msk.f32.vlgmr.msra.gmra.mxu1 %vm100_vm2, %v584_v41 }
0x1084   :  { %v604_v42 = vpop.f32.mrf.mxu1 }
0x1085   :  { %v608_v43 = vrot.slane %v604_v42, 2 }
0x1087   :  { %v610_v44 = vadd.f32 %v608_v43, %v959_v10 }
0x1089   :  { %797 = vtanh.f32 %v610_v44  ;;  %v733_v35 = vmul.f32 -1.442695, %v610_v44 }
0x108b   :  { %799 = vpow2.f32 %v733_v35 }
0x108f   :  { %v798_v45 = vpop.eup %797 }
0x1090   :  { %636 = vrot.lane.b32.xlu2 %v798_v45, %s861_s1 }
0x1091   :  { %v800_v46 = vpop.eup %799 }
0x1092   :  { %v614_v47 = vadd.f32 1.0, %v800_v46 }
0x1094   :  { %801 = vrcp.f32 %v614_v47  ;;  %v626_v9 = vand.u32 2147483648, %v614_v47  ;;  %vm620_vm1 = vweird.f32 %v614_v47  ;;  %v624_v53 = vand.u32 2147483647, %v614_v47 }
0x1096   :  { %v627_v54 = vor.u32 1.1754944e-38, %v626_v9  ;;  %vm625_vm10 = vcmp.eq.f32.partialorder %v624_v53, 8.507059e+37 }
0x109a   :  { %v802_v48 = vpop.eup %801 }
0x109b   :  { %v616_v49 = vmul.f32 %v802_v48, %v614_v47  ;;  %vm621_vm8 = vweird.f32 %v802_v48 }
0x109c   :  { %vm622_vm9 = vmor %vm620_vm1, %vm621_vm8 }
0x109d   :  { %v617_v50 = vsub.f32 1.0, %v616_v49 }
0x109f   :  { %v618_v51 = vmul.f32 %v802_v48, %v617_v50 }
0x10a1   :  { %v619_v52 = vadd.f32 %v802_v48, %v618_v51 }
0x10a3   :  { %v623_v10 = vsel %vm622_vm9, %v802_v48, %v619_v52 }
0x10a4   :  { %v628_v56 = vsel %vm625_vm10, %v627_v54, %v623_v10 }
0x10a5   :  { %v634_v59 = vmul.f32 %v632_v58, %v628_v56 }
0x10ea   :  { %v637_v55 = vpop.permute.xlu2 %636 }
0x10eb   :  { %v639_v57 = vmul.f32 %v637_v55, %v628_v56 }
0x10ed   :  { %641 = vrot.lane.b32.xlu0 %v639_v57, %s862_s14 }
0x115f   :  { %v642_v60 = vpop.permute.xlu0 %641 }
0x1160   :  { %v644_v61 = vadd.f32 %v642_v60, %v634_v59 }
0x1162   :  { %803 = vtanh.f32 %v644_v61 }
0x1168   :  { %v804_v62 = vpop.eup %803 }
0x1169   :  { %647 = vrot.lane.b32.xlu1 %v804_v62, %s861_s1 }
0x11db   :  { %v648_v63 = vpop.permute.xlu1 %647 }
0x11dc   :  { %v650_v0 = vmul.f32 %v648_v63, %v628_v56 }
0x11de   :  { %v664_v1 = vrot.slane %v650_v0, 7  ;;  %v698_v2 = vsel %vm677_vm11, %v697_v39, %v650_v0 }
0x11df   :  { %703 = vrot.lane.b32.xlu0 %v698_v2, %s862_s14 }
0x11e0   :  { %v678_v3 = vsel %vm677_vm11, %v676_v40, %v664_v1 }
0x11e1   :  { %701 = vrot.lane.b32.xlu2 %v678_v3, %s862_s14 }
0x123b   :  { %v702_v4 = vpop.permute.xlu2 %701 }
0x123c   :  { %707 = vst.msk [vmem:[%s1001_s6] sm:$0xff] %vm100_vm2, %v702_v4 }
0x1251   :  { %v704_v5 = vpop.permute.xlu0 %703 }
0x1252   :  { %708 = vst.msk [vmem:[%s1001_s6 + $0x8] sm:$0xff] %vm100_vm2, %v704_v5 }
0x1253   :  { %713 = vsyncpa [#allocation3], 1 }
0x1254   :  { %714 = vsyncpa [#allocation5], 1 }

</bundles_post_ra>
